<compile_context>
chip_gen: v7x
topology: tpu7x:2x2x1
jax: 0.10.0
libtpu: 0.0.40
codegen_flags: <defaults>
</compile_context>

<pallas_src>
import jax
import jax.numpy as jnp
from jax import lax
from jax.experimental import pallas as pl
from jax.experimental.pallas import tpu as pltpu

LRELU_SLOPE = 0.1
K = 3                   # kernel_size
DILATIONS = (1, 3)      # dilations used by convs1 in this module (dilation[0], dilation[1])

HP = 8                  # halo rows fetched on each side of a time tile (sublane aligned)
SCR = 8                 # zero-pad rows on each side of the in-kernel tap scratch (>= max pad 3)

# Total receptive radius of the chained convs: (1 + 1) + (3 + 1) = 6  <= HP.
_RF = sum(d * (K - 1) // 2 for d in DILATIONS) + len(DILATIONS) * ((K - 1) // 2)
assert HP >= _RF


def leaky_relu(x, slope=LRELU_SLOPE):
    return jnp.where(x >= 0, x, slope * x)


def _make_kernel(T_true, TT, C):
    """Build the per-(batch, time-tile) kernel. T_true = un-padded sequence length."""
    TTE = TT + 2 * HP          # extended (halo'd) tile length

    def kernel(xl_ref, xc_ref, xr_ref, w1_ref, b1_ref, w2_ref, b2_ref,
               o_ref, x_ref, pad_ref):
        j = pl.program_id(1)

        # Residual state: write halo + center blocks straight into the f32 scratch
        # (no value concat / carry -> less spill churn).
        x_ref[pl.ds(0, HP), :] = xl_ref[...].astype(jnp.float32)
        x_ref[pl.ds(HP, TT), :] = xc_ref[...].astype(jnp.float32)
        x_ref[pl.ds(HP + TT, HP), :] = xr_ref[...].astype(jnp.float32)

        # Zero the bf16 tap-scratch pad strips once per tile (cheap: 2*SCR rows).
        zstrip = jnp.zeros((SCR, C), pad_ref.dtype)
        pad_ref[pl.ds(0, SCR), :] = zstrip
        pad_ref[pl.ds(SCR + TTE, SCR), :] = zstrip

        # Validity mask over the extended tile: global row g in [0, T_true).  Reproduces
        # torch's zero padding at the true sequence ends for every conv input.
        e = lax.broadcasted_iota(jnp.int32, (TTE, 1), 0)
        g = e + (j * TT - HP)
        valid = jnp.logical_and(g >= 0, g < T_true)            # (TTE, 1)

        def conv_same(xin, w_ref, b_ref, i, d):
            # 'same' Conv1d (kernel 3, dilation d) as ONE folded MXU matmul:
            # masked bf16 input -> padded VMEM scratch, 3 shifted (static pl.ds) tap
            # views stacked along channels, (TTE, 3C) @ (3C, C) with f32 accumulation.
            pad_ref[pl.ds(SCR, TTE), :] = jnp.where(valid, xin, 0.0).astype(pad_ref.dtype)
            taps = [pad_ref[pl.ds(SCR + (k - 1) * d, TTE), :] for k in range(K)]
            stacked = jnp.concatenate(taps, axis=-1)            # (TTE, 3C) bf16
            return jnp.dot(stacked, w_ref[i],                   # (3C, C) bf16 folded weight
                           preferred_element_type=jnp.float32) + b_ref[i]

        for i, d in enumerate(DILATIONS):
            xt = conv_same(leaky_relu(x_ref[...]), w1_ref, b1_ref, i, d)
            xt = conv_same(leaky_relu(xt), w2_ref, b2_ref, i, 1)
            x_ref[...] = x_ref[...] + xt

        # Only the clean center rows are written out.
        o_ref[...] = x_ref[pl.ds(HP, TT), :].astype(o_ref.dtype)

    return kernel


def _vmem_limit_bytes():
    """Generation-aware scoped-VMEM limit (~half the physical per-core capacity)."""
    cap = 0
    try:
        cap = int(pltpu.get_tpu_info().vmem_capacity_bytes)
    except Exception:
        cap = 0
    if cap <= 0:
        cap = 128 * 1024 * 1024
    return int(min(max(cap // 2, 8 * 1024 * 1024), 64 * 1024 * 1024))


def _choose_time_tile(B, T, C, itemsize, vmem_limit):
    """Pick a time-tile length (multiple of 8) that fits ~half the scoped VMEM limit."""
    budget = vmem_limit // 2
    # Resident bf16 weights + f32 biases, counted with the pipeline's double buffers.
    # TODO(synk): pipeline_mode=pl.Buffered(1) on the weight specs would halve this.
    w_bytes = 2 * (2 * (2 * K * C * C * 2) + 2 * (2 * C * 4))
    per_row = C * (
        4 * itemsize          # center input + output blocks, double buffered
        + 4 + 2               # f32 residual scratch + bf16 tap scratch
        + 3 * 2 + 3 * 4       # bf16 tap stack + f32 conv/lrelu temporaries
    )
    tt = (budget - w_bytes) // max(per_row, 1)
    tt = int(max(128, min(1024, tt)))
    if B == 1:
        # Keep at least two time tiles so both TensorCores get work (v7x megacore).
        tt = min(tt, max(8, ((T // 2 + 7) // 8) * 8))
    tt = min(tt, ((T + 7) // 8) * 8)   # never bigger than the (rounded) sequence
    return max(8, (tt // 8) * 8)


def resblock1_forward(x_ncl, w1, b1, w2, b2, tt=None):
    """x_ncl: (B, C, T).  w1/w2: (2, Cout, Cin, K) torch layout.  b1/b2: (2, Cout)."""
    B, C, T = x_ncl.shape
    x_btc = jnp.transpose(x_ncl, (0, 2, 1))                    # (B, T, C)

    vmem_limit = _vmem_limit_bytes()
    if tt is None:
        tt = _choose_time_tile(B, T, C, x_btc.dtype.itemsize, vmem_limit)
    TT = max(8, (int(tt) // 8) * 8)
    nT = pl.cdiv(T, TT)
    T_pad = nT * TT
    if T_pad != T:
        x_btc = jnp.pad(x_btc, ((0, 0), (0, T_pad - T), (0, 0)))

    # torch (Cout, Cin, K) -> folded (K*Cin, Cout) bf16 so each conv is one MXU matmul.
    w1k = jnp.transpose(w1, (0, 3, 2, 1)).reshape(2, K * C, C).astype(jnp.bfloat16)
    w2k = jnp.transpose(w2, (0, 3, 2, 1)).reshape(2, K * C, C).astype(jnp.bfloat16)
    b1r = b1.reshape(2, 1, C).astype(jnp.float32)
    b2r = b2.reshape(2, 1, C).astype(jnp.float32)

    nhp = TT // HP            # HP-sized blocks per time tile
    nhb = T_pad // HP         # HP-sized blocks along the padded time axis
    TTE = TT + 2 * HP

    kernel = _make_kernel(T, TT, C)

    # Advisory cost so XLA schedules the wrapper transposes/pads around the custom call.
    flops = 8 * K * C * C * T * B               # 4 convs x 2*K*C MACs per output element
    bytes_accessed = int(2 * B * T_pad * C * x_btc.dtype.itemsize
                         + 2 * (w1k.size + w2k.size) + 4 * (b1r.size + b2r.size))
    cost = pl.CostEstimate(flops=int(flops), transcendentals=0,
                           bytes_accessed=bytes_accessed)

    out = pl.pallas_call(
        kernel,
        out_shape=jax.ShapeDtypeStruct((B, T_pad, C), x_btc.dtype),
        grid_spec=pltpu.PrefetchScalarGridSpec(
            num_scalar_prefetch=0,
            grid=(B, nT),
            in_specs=[
                # left halo: HP rows just before the tile (clamped at j=0; masked in-kernel)
                pl.BlockSpec((None, HP, C),
                             lambda b, j: (b, jnp.maximum(j * nhp - 1, 0), 0)),
                # center tile
                pl.BlockSpec((None, TT, C), lambda b, j: (b, j, 0)),
                # right halo: HP rows just after the tile (clamped at the end; masked)
                pl.BlockSpec((None, HP, C),
                             lambda b, j: (b, jnp.minimum((j + 1) * nhp, nhb - 1), 0)),
                # weights / biases: constant block index -> stay resident in VMEM.
                # TODO(synk): add pipeline_mode=pl.Buffered(1) here for v7x VMEM savings.
                pl.BlockSpec((2, K * C, C), lambda b, j: (0, 0, 0)),
                pl.BlockSpec((2, 1, C), lambda b, j: (0, 0, 0)),
                pl.BlockSpec((2, K * C, C), lambda b, j: (0, 0, 0)),
                pl.BlockSpec((2, 1, C), lambda b, j: (0, 0, 0)),
            ],
            out_specs=pl.BlockSpec((None, TT, C), lambda b, j: (b, j, 0)),
            scratch_shapes=[pltpu.VMEM((TTE, C), jnp.float32),            # residual state
                            pltpu.VMEM((TTE + 2 * SCR, C), jnp.bfloat16)],  # tap scratch
        ),
        compiler_params=pltpu.CompilerParams(
            dimension_semantics=("parallel", "parallel"),
            vmem_limit_bytes=vmem_limit,
        ),
        cost_estimate=cost,
    )(x_btc, x_btc, x_btc, w1k, b1r, w2k, b2r)

    out = out[:, :T, :]
    return jnp.transpose(out, (0, 2, 1))                       # back to (B, C, T)


def resblock1_ref(x, w1, b1, w2, b2):
    """Pure-JAX f32 reference (lax conv), torch-layout weights, NCL input."""
    def conv(x, w, b, d):
        pad = d * (K - 1) // 2
        y = lax.conv_general_dilated(
            x, w, window_strides=(1,), padding=[(pad, pad)],
            rhs_dilation=(d,), dimension_numbers=('NCH', 'OIH', 'NCH'))
        return y + b[None, :, None]
    for i, d in enumerate(DILATIONS):
        xt = leaky_relu(x)
        xt = conv(xt, w1[i], b1[i], d)
        xt = leaky_relu(xt)
        xt = conv(xt, w2[i], b2[i], 1)
        x = xt + x
    return x


if __name__ == "__main__":
    B, C, T = 2, 16, 50
    key = jax.random.PRNGKey(0)
    kx, kw1, kb1, kw2, kb2 = jax.random.split(key, 5)

    x = jax.random.normal(kx, (B, C, T), dtype=jnp.float32)
    # init_weights: normal(mean=0, std=0.01) on conv weights
    w1 = 0.01 * jax.random.normal(kw1, (2, C, C, K), dtype=jnp.float32)
    w2 = 0.01 * jax.random.normal(kw2, (2, C, C, K), dtype=jnp.float32)
    b1 = 0.01 * jax.random.normal(kb1, (2, C), dtype=jnp.float32)
    b2 = 0.01 * jax.random.normal(kb2, (2, C), dtype=jnp.float32)

    y_ref = resblock1_ref(x, w1, b1, w2, b2)

    # tt=16 forces multiple time tiles (grid=(2, 4)) so halo + boundary-masking paths run.
    y_tiled = jax.block_until_ready(resblock1_forward(x, w1, b1, w2, b2, tt=16))
    # Adaptive tile size (single tile covering the whole padded sequence).
    y_auto = jax.block_until_ready(resblock1_forward(x, w1, b1, w2, b2))

    assert y_tiled.shape == (B, C, T) and y_auto.shape == (B, C, T)
    # bf16 MXU inputs (f32 accumulation) -> looser tolerance than a pure-f32 forward.
    err_t = float(jnp.max(jnp.abs(y_tiled - y_ref)))
    err_a = float(jnp.max(jnp.abs(y_auto - y_ref)))
    assert err_t < 2e-2, f"tiled max err {err_t}"
    assert err_a < 2e-2, f"auto max err {err_a}"
    print("KERNEL_OK")
</pallas_src>

<mosaic_0001>
module attributes {stable_mosaic.version = 11 : i64} {
  func.func @kernel(%arg0: i32, %arg1: i32, %arg2: memref<1x8x16xf32, #tpu.memory_space<vmem>>, %arg3: memref<1x16x16xf32, #tpu.memory_space<vmem>>, %arg4: memref<1x8x16xf32, #tpu.memory_space<vmem>>, %arg5: memref<2x48x16xbf16, #tpu.memory_space<vmem>>, %arg6: memref<2x1x16xf32, #tpu.memory_space<vmem>>, %arg7: memref<2x48x16xbf16, #tpu.memory_space<vmem>>, %arg8: memref<2x1x16xf32, #tpu.memory_space<vmem>>, %arg9: memref<1x16x16xf32, #tpu.memory_space<vmem>>, %arg10: memref<32x16xf32, #tpu.memory_space<vmem>>, %arg11: memref<48x16xbf16, #tpu.memory_space<vmem>>) attributes {dimension_semantics = [#tpu.dimension_semantics<parallel>, #tpu.dimension_semantics<parallel>], iteration_bounds = array<i64: 2, 4>, scalar_prefetch = 0 : i64, scratch_operands = 2 : i64, tpu.core_type = #tpu.core_type<tc>, window_params = [{transform_indices = @transform_0, window_bounds = array<i64: 1, 8, 16>}, {transform_indices = @transform_1, window_bounds = array<i64: 1, 16, 16>}, {transform_indices = @transform_2, window_bounds = array<i64: 1, 8, 16>}, {pipeline_mode = #tpu.pipeline_mode<synchronous>, transform_indices = @transform_3, window_bounds = array<i64: 2, 48, 16>}, {pipeline_mode = #tpu.pipeline_mode<synchronous>, transform_indices = @transform_4, window_bounds = array<i64: 2, 1, 16>}, {pipeline_mode = #tpu.pipeline_mode<synchronous>, transform_indices = @transform_5, window_bounds = array<i64: 2, 48, 16>}, {pipeline_mode = #tpu.pipeline_mode<synchronous>, transform_indices = @transform_6, window_bounds = array<i64: 2, 1, 16>}, {transform_indices = @transform_7, window_bounds = array<i64: 1, 16, 16>}]} {
    %c0 = arith.constant 0 : index
    %c0_0 = arith.constant 0 : index
    %c0_1 = arith.constant 0 : index
    %0 = vector.load %arg2[%c0, %c0_0, %c0_1] : memref<1x8x16xf32, #tpu.memory_space<vmem>>, vector<1x8x16xf32>
    %1 = vector.shape_cast %0 : vector<1x8x16xf32> to vector<8x16xf32>
    %c0_2 = arith.constant 0 : index
    %c0_3 = arith.constant 0 : index
    %2 = vector.load %arg10[%c0_2, %c0_3] : memref<32x16xf32, #tpu.memory_space<vmem>>, vector<8x16xf32>
    tpu.vector_store %arg10[%c0_2, %c0_3], %1 {strides = array<i32>} : memref<32x16xf32, #tpu.memory_space<vmem>>, vector<8x16xf32>,
    %c0_4 = arith.constant 0 : index
    %c0_5 = arith.constant 0 : index
    %c0_6 = arith.constant 0 : index
    %3 = vector.load %arg3[%c0_4, %c0_5, %c0_6] : memref<1x16x16xf32, #tpu.memory_space<vmem>>, vector<1x16x16xf32>
    %4 = vector.shape_cast %3 : vector<1x16x16xf32> to vector<16x16xf32>
    %c8 = arith.constant 8 : index
    %c0_7 = arith.constant 0 : index
    %5 = vector.load %arg10[%c8, %c0_7] : memref<32x16xf32, #tpu.memory_space<vmem>>, vector<16x16xf32>
    tpu.vector_store %arg10[%c8, %c0_7], %4 {strides = array<i32>} : memref<32x16xf32, #tpu.memory_space<vmem>>, vector<16x16xf32>,
    %c0_8 = arith.constant 0 : index
    %c0_9 = arith.constant 0 : index
    %c0_10 = arith.constant 0 : index
    %6 = vector.load %arg4[%c0_8, %c0_9, %c0_10] : memref<1x8x16xf32, #tpu.memory_space<vmem>>, vector<1x8x16xf32>
    %7 = vector.shape_cast %6 : vector<1x8x16xf32> to vector<8x16xf32>
    %c24 = arith.constant 24 : index
    %c0_11 = arith.constant 0 : index
    %8 = vector.load %arg10[%c24, %c0_11] : memref<32x16xf32, #tpu.memory_space<vmem>>, vector<8x16xf32>
    tpu.vector_store %arg10[%c24, %c0_11], %7 {strides = array<i32>} : memref<32x16xf32, #tpu.memory_space<vmem>>, vector<8x16xf32>,
    %cst = arith.constant 0.000000e+00 : bf16
    %9 = vector.broadcast %cst : bf16 to vector<8x16xbf16>
    %c0_12 = arith.constant 0 : index
    %c0_13 = arith.constant 0 : index
    %10 = vector.load %arg11[%c0_12, %c0_13] : memref<48x16xbf16, #tpu.memory_space<vmem>>, vector<8x16xbf16>
    tpu.vector_store %arg11[%c0_12, %c0_13], %9 {strides = array<i32>} : memref<48x16xbf16, #tpu.memory_space<vmem>>, vector<8x16xbf16>,
    %c40 = arith.constant 40 : index
    %c0_14 = arith.constant 0 : index
    %11 = vector.load %arg11[%c40, %c0_14] : memref<48x16xbf16, #tpu.memory_space<vmem>>, vector<8x16xbf16>
    tpu.vector_store %arg11[%c40, %c0_14], %9 {strides = array<i32>} : memref<48x16xbf16, #tpu.memory_space<vmem>>, vector<8x16xbf16>,
    %12 = tpu.iota {dimensions = array<i32: 0>} : vector<32x1xi32>
    %c16_i32 = arith.constant 16 : i32
    %13 = arith.muli %arg1, %c16_i32 : i32
    %c8_i32 = arith.constant 8 : i32
    %14 = arith.subi %13, %c8_i32 : i32
    %15 = vector.broadcast %14 : i32 to vector<32x1xi32>
    %16 = arith.addi %12, %15 : vector<32x1xi32>
    %c0_i32 = arith.constant 0 : i32
    %17 = vector.broadcast %c0_i32 : i32 to vector<32x1xi32>
    %18 = arith.cmpi sge, %16, %17 : vector<32x1xi32>
    %c50_i32 = arith.constant 50 : i32
    %19 = vector.broadcast %c50_i32 : i32 to vector<32x1xi32>
    %20 = arith.cmpi slt, %16, %19 : vector<32x1xi32>
    %21 = arith.andi %18, %20 : vector<32x1xi1>
    %c0_15 = arith.constant 0 : index
    %c0_16 = arith.constant 0 : index
    %22 = vector.load %arg10[%c0_15, %c0_16] : memref<32x16xf32, #tpu.memory_space<vmem>>, vector<32x16xf32>
    %cst_17 = arith.constant 0.000000e+00 : f32
    %23 = vector.broadcast %cst_17 : f32 to vector<32x16xf32>
    %24 = arith.cmpf oge, %22, %23 : vector<32x16xf32>
    %cst_18 = arith.constant 1.000000e-01 : f32
    %25 = vector.broadcast %cst_18 : f32 to vector<32x16xf32>
    %26 = arith.mulf %25, %22 : vector<32x16xf32>
    %27 = arith.select %24, %22, %26 : vector<32x16xi1>, vector<32x16xf32>
    %cst_19 = arith.constant 0.000000e+00 : f32
    %28 = vector.shape_cast %21 : vector<32x1xi1> to vector<32x1xi1>
    %29 = vector.broadcast %28 : vector<32x1xi1> to vector<32x16xi1>
    %30 = vector.broadcast %cst_19 : f32 to vector<32x16xf32>
    %31 = arith.select %29, %27, %30 : vector<32x16xi1>, vector<32x16xf32>
    %32 = arith.truncf %31 : vector<32x16xf32> to vector<32x16xbf16>
    %c8_20 = arith.constant 8 : index
    %c0_21 = arith.constant 0 : index
    %33 = vector.load %arg11[%c8_20, %c0_21] : memref<48x16xbf16, #tpu.memory_space<vmem>>, vector<32x16xbf16>
    tpu.vector_store %arg11[%c8_20, %c0_21], %32 {strides = array<i32>} : memref<48x16xbf16, #tpu.memory_space<vmem>>, vector<32x16xbf16>,
    %c7 = arith.constant 7 : index
    %c0_22 = arith.constant 0 : index
    %34 = vector.load %arg11[%c7, %c0_22] : memref<48x16xbf16, #tpu.memory_space<vmem>>, vector<32x16xbf16>
    %c8_23 = arith.constant 8 : index
    %c0_24 = arith.constant 0 : index
    %35 = vector.load %arg11[%c8_23, %c0_24] : memref<48x16xbf16, #tpu.memory_space<vmem>>, vector<32x16xbf16>
    %c9 = arith.constant 9 : index
    %c0_25 = arith.constant 0 : index
    %36 = vector.load %arg11[%c9, %c0_25] : memref<48x16xbf16, #tpu.memory_space<vmem>>, vector<32x16xbf16>
    %37 = tpu.concatenate %34, %35, %36 in 1 : vector<32x16xbf16>, vector<32x16xbf16>, vector<32x16xbf16> -> vector<32x48xbf16>
    %c0_26 = arith.constant 0 : index
    %c0_27 = arith.constant 0 : index
    %c0_28 = arith.constant 0 : index
    %38 = vector.load %arg5[%c0_26, %c0_27, %c0_28] : memref<2x48x16xbf16, #tpu.memory_space<vmem>>, vector<1x48x16xbf16>
    %39 = vector.shape_cast %38 : vector<1x48x16xbf16> to vector<48x16xbf16>
    %cst_29 = arith.constant dense<0.000000e+00> : vector<32x16xf32>
    %40 = tpu.matmul %37, %39, %cst_29 {dimension_numbers = #tpu.dot_dimension_numbers<[1], [0], [0], [1], [0, 0, 1, 1], [], []>} : vector<32x48xbf16>, vector<48x16xbf16>, vector<32x16xf32> -> vector<32x16xf32>
    %c0_30 = arith.constant 0 : index
    %c0_31 = arith.constant 0 : index
    %c0_32 = arith.constant 0 : index
    %41 = vector.load %arg6[%c0_30, %c0_31, %c0_32] : memref<2x1x16xf32, #tpu.memory_space<vmem>>, vector<1x1x16xf32>
    %42 = vector.shape_cast %41 : vector<1x1x16xf32> to vector<1x16xf32>
    %43 = vector.broadcast %42 : vector<1x16xf32> to vector<32x16xf32>
    %44 = arith.addf %40, %43 : vector<32x16xf32>
    %cst_33 = arith.constant 0.000000e+00 : f32
    %45 = vector.broadcast %cst_33 : f32 to vector<32x16xf32>
    %46 = arith.cmpf oge, %44, %45 : vector<32x16xf32>
    %cst_34 = arith.constant 1.000000e-01 : f32
    %47 = vector.broadcast %cst_34 : f32 to vector<32x16xf32>
    %48 = arith.mulf %47, %44 : vector<32x16xf32>
    %49 = arith.select %46, %44, %48 : vector<32x16xi1>, vector<32x16xf32>
    %cst_35 = arith.constant 0.000000e+00 : f32
    %50 = vector.shape_cast %21 : vector<32x1xi1> to vector<32x1xi1>
    %51 = vector.broadcast %50 : vector<32x1xi1> to vector<32x16xi1>
    %52 = vector.broadcast %cst_35 : f32 to vector<32x16xf32>
    %53 = arith.select %51, %49, %52 : vector<32x16xi1>, vector<32x16xf32>
    %54 = arith.truncf %53 : vector<32x16xf32> to vector<32x16xbf16>
    %c8_36 = arith.constant 8 : index
    %c0_37 = arith.constant 0 : index
    %55 = vector.load %arg11[%c8_36, %c0_37] : memref<48x16xbf16, #tpu.memory_space<vmem>>, vector<32x16xbf16>
    tpu.vector_store %arg11[%c8_36, %c0_37], %54 {strides = array<i32>} : memref<48x16xbf16, #tpu.memory_space<vmem>>, vector<32x16xbf16>,
    %c7_38 = arith.constant 7 : index
    %c0_39 = arith.constant 0 : index
    %56 = vector.load %arg11[%c7_38, %c0_39] : memref<48x16xbf16, #tpu.memory_space<vmem>>, vector<32x16xbf16>
    %c8_40 = arith.constant 8 : index
    %c0_41 = arith.constant 0 : index
    %57 = vector.load %arg11[%c8_40, %c0_41] : memref<48x16xbf16, #tpu.memory_space<vmem>>, vector<32x16xbf16>
    %c9_42 = arith.constant 9 : index
    %c0_43 = arith.constant 0 : index
    %58 = vector.load %arg11[%c9_42, %c0_43] : memref<48x16xbf16, #tpu.memory_space<vmem>>, vector<32x16xbf16>
    %59 = tpu.concatenate %56, %57, %58 in 1 : vector<32x16xbf16>, vector<32x16xbf16>, vector<32x16xbf16> -> vector<32x48xbf16>
    %c0_44 = arith.constant 0 : index
    %c0_45 = arith.constant 0 : index
    %c0_46 = arith.constant 0 : index
    %60 = vector.load %arg7[%c0_44, %c0_45, %c0_46] : memref<2x48x16xbf16, #tpu.memory_space<vmem>>, vector<1x48x16xbf16>
    %61 = vector.shape_cast %60 : vector<1x48x16xbf16> to vector<48x16xbf16>
    %cst_47 = arith.constant dense<0.000000e+00> : vector<32x16xf32>
    %62 = tpu.matmul %59, %61, %cst_47 {dimension_numbers = #tpu.dot_dimension_numbers<[1], [0], [0], [1], [0, 0, 1, 1], [], []>} : vector<32x48xbf16>, vector<48x16xbf16>, vector<32x16xf32> -> vector<32x16xf32>
    %c0_48 = arith.constant 0 : index
    %c0_49 = arith.constant 0 : index
    %c0_50 = arith.constant 0 : index
    %63 = vector.load %arg8[%c0_48, %c0_49, %c0_50] : memref<2x1x16xf32, #tpu.memory_space<vmem>>, vector<1x1x16xf32>
    %64 = vector.shape_cast %63 : vector<1x1x16xf32> to vector<1x16xf32>
    %65 = vector.broadcast %64 : vector<1x16xf32> to vector<32x16xf32>
    %66 = arith.addf %62, %65 : vector<32x16xf32>
    %c0_51 = arith.constant 0 : index
    %c0_52 = arith.constant 0 : index
    %67 = vector.load %arg10[%c0_51, %c0_52] : memref<32x16xf32, #tpu.memory_space<vmem>>, vector<32x16xf32>
    %68 = arith.addf %67, %66 : vector<32x16xf32>
    %c0_53 = arith.constant 0 : index
    %c0_54 = arith.constant 0 : index
    %69 = vector.load %arg10[%c0_53, %c0_54] : memref<32x16xf32, #tpu.memory_space<vmem>>, vector<32x16xf32>
    tpu.vector_store %arg10[%c0_53, %c0_54], %68 {strides = array<i32>} : memref<32x16xf32, #tpu.memory_space<vmem>>, vector<32x16xf32>,
    %c0_55 = arith.constant 0 : index
    %c0_56 = arith.constant 0 : index
    %70 = vector.load %arg10[%c0_55, %c0_56] : memref<32x16xf32, #tpu.memory_space<vmem>>, vector<32x16xf32>
    %cst_57 = arith.constant 0.000000e+00 : f32
    %71 = vector.broadcast %cst_57 : f32 to vector<32x16xf32>
    %72 = arith.cmpf oge, %70, %71 : vector<32x16xf32>
    %cst_58 = arith.constant 1.000000e-01 : f32
    %73 = vector.broadcast %cst_58 : f32 to vector<32x16xf32>
    %74 = arith.mulf %73, %70 : vector<32x16xf32>
    %75 = arith.select %72, %70, %74 : vector<32x16xi1>, vector<32x16xf32>
    %cst_59 = arith.constant 0.000000e+00 : f32
    %76 = vector.shape_cast %21 : vector<32x1xi1> to vector<32x1xi1>
    %77 = vector.broadcast %76 : vector<32x1xi1> to vector<32x16xi1>
    %78 = vector.broadcast %cst_59 : f32 to vector<32x16xf32>
    %79 = arith.select %77, %75, %78 : vector<32x16xi1>, vector<32x16xf32>
    %80 = arith.truncf %79 : vector<32x16xf32> to vector<32x16xbf16>
    %c8_60 = arith.constant 8 : index
    %c0_61 = arith.constant 0 : index
    %81 = vector.load %arg11[%c8_60, %c0_61] : memref<48x16xbf16, #tpu.memory_space<vmem>>, vector<32x16xbf16>
    tpu.vector_store %arg11[%c8_60, %c0_61], %80 {strides = array<i32>} : memref<48x16xbf16, #tpu.memory_space<vmem>>, vector<32x16xbf16>,
    %c5 = arith.constant 5 : index
    %c0_62 = arith.constant 0 : index
    %82 = vector.load %arg11[%c5, %c0_62] : memref<48x16xbf16, #tpu.memory_space<vmem>>, vector<32x16xbf16>
    %c8_63 = arith.constant 8 : index
    %c0_64 = arith.constant 0 : index
    %83 = vector.load %arg11[%c8_63, %c0_64] : memref<48x16xbf16, #tpu.memory_space<vmem>>, vector<32x16xbf16>
    %c11 = arith.constant 11 : index
    %c0_65 = arith.constant 0 : index
    %84 = vector.load %arg11[%c11, %c0_65] : memref<48x16xbf16, #tpu.memory_space<vmem>>, vector<32x16xbf16>
    %85 = tpu.concatenate %82, %83, %84 in 1 : vector<32x16xbf16>, vector<32x16xbf16>, vector<32x16xbf16> -> vector<32x48xbf16>
    %c1 = arith.constant 1 : index
    %c0_66 = arith.constant 0 : index
    %c0_67 = arith.constant 0 : index
    %86 = vector.load %arg5[%c1, %c0_66, %c0_67] : memref<2x48x16xbf16, #tpu.memory_space<vmem>>, vector<1x48x16xbf16>
    %87 = vector.shape_cast %86 : vector<1x48x16xbf16> to vector<48x16xbf16>
    %cst_68 = arith.constant dense<0.000000e+00> : vector<32x16xf32>
    %88 = tpu.matmul %85, %87, %cst_68 {dimension_numbers = #tpu.dot_dimension_numbers<[1], [0], [0], [1], [0, 0, 1, 1], [], []>} : vector<32x48xbf16>, vector<48x16xbf16>, vector<32x16xf32> -> vector<32x16xf32>
    %c1_69 = arith.constant 1 : index
    %c0_70 = arith.constant 0 : index
    %c0_71 = arith.constant 0 : index
    %89 = vector.load %arg6[%c1_69, %c0_70, %c0_71] : memref<2x1x16xf32, #tpu.memory_space<vmem>>, vector<1x1x16xf32>
    %90 = vector.shape_cast %89 : vector<1x1x16xf32> to vector<1x16xf32>
    %91 = vector.broadcast %90 : vector<1x16xf32> to vector<32x16xf32>
    %92 = arith.addf %88, %91 : vector<32x16xf32>
    %cst_72 = arith.constant 0.000000e+00 : f32
    %93 = vector.broadcast %cst_72 : f32 to vector<32x16xf32>
    %94 = arith.cmpf oge, %92, %93 : vector<32x16xf32>
    %cst_73 = arith.constant 1.000000e-01 : f32
    %95 = vector.broadcast %cst_73 : f32 to vector<32x16xf32>
    %96 = arith.mulf %95, %92 : vector<32x16xf32>
    %97 = arith.select %94, %92, %96 : vector<32x16xi1>, vector<32x16xf32>
    %cst_74 = arith.constant 0.000000e+00 : f32
    %98 = vector.shape_cast %21 : vector<32x1xi1> to vector<32x1xi1>
    %99 = vector.broadcast %98 : vector<32x1xi1> to vector<32x16xi1>
    %100 = vector.broadcast %cst_74 : f32 to vector<32x16xf32>
    %101 = arith.select %99, %97, %100 : vector<32x16xi1>, vector<32x16xf32>
    %102 = arith.truncf %101 : vector<32x16xf32> to vector<32x16xbf16>
    %c8_75 = arith.constant 8 : index
    %c0_76 = arith.constant 0 : index
    %103 = vector.load %arg11[%c8_75, %c0_76] : memref<48x16xbf16, #tpu.memory_space<vmem>>, vector<32x16xbf16>
    tpu.vector_store %arg11[%c8_75, %c0_76], %102 {strides = array<i32>} : memref<48x16xbf16, #tpu.memory_space<vmem>>, vector<32x16xbf16>,
    %c7_77 = arith.constant 7 : index
    %c0_78 = arith.constant 0 : index
    %104 = vector.load %arg11[%c7_77, %c0_78] : memref<48x16xbf16, #tpu.memory_space<vmem>>, vector<32x16xbf16>
    %c8_79 = arith.constant 8 : index
    %c0_80 = arith.constant 0 : index
    %105 = vector.load %arg11[%c8_79, %c0_80] : memref<48x16xbf16, #tpu.memory_space<vmem>>, vector<32x16xbf16>
    %c9_81 = arith.constant 9 : index
    %c0_82 = arith.constant 0 : index
    %106 = vector.load %arg11[%c9_81, %c0_82] : memref<48x16xbf16, #tpu.memory_space<vmem>>, vector<32x16xbf16>
    %107 = tpu.concatenate %104, %105, %106 in 1 : vector<32x16xbf16>, vector<32x16xbf16>, vector<32x16xbf16> -> vector<32x48xbf16>
    %c1_83 = arith.constant 1 : index
    %c0_84 = arith.constant 0 : index
    %c0_85 = arith.constant 0 : index
    %108 = vector.load %arg7[%c1_83, %c0_84, %c0_85] : memref<2x48x16xbf16, #tpu.memory_space<vmem>>, vector<1x48x16xbf16>
    %109 = vector.shape_cast %108 : vector<1x48x16xbf16> to vector<48x16xbf16>
    %cst_86 = arith.constant dense<0.000000e+00> : vector<32x16xf32>
    %110 = tpu.matmul %107, %109, %cst_86 {dimension_numbers = #tpu.dot_dimension_numbers<[1], [0], [0], [1], [0, 0, 1, 1], [], []>} : vector<32x48xbf16>, vector<48x16xbf16>, vector<32x16xf32> -> vector<32x16xf32>
    %c1_87 = arith.constant 1 : index
    %c0_88 = arith.constant 0 : index
    %c0_89 = arith.constant 0 : index
    %111 = vector.load %arg8[%c1_87, %c0_88, %c0_89] : memref<2x1x16xf32, #tpu.memory_space<vmem>>, vector<1x1x16xf32>
    %112 = vector.shape_cast %111 : vector<1x1x16xf32> to vector<1x16xf32>
    %113 = vector.broadcast %112 : vector<1x16xf32> to vector<32x16xf32>
    %114 = arith.addf %110, %113 : vector<32x16xf32>
    %c0_90 = arith.constant 0 : index
    %c0_91 = arith.constant 0 : index
    %115 = vector.load %arg10[%c0_90, %c0_91] : memref<32x16xf32, #tpu.memory_space<vmem>>, vector<32x16xf32>
    %116 = arith.addf %115, %114 : vector<32x16xf32>
    %c0_92 = arith.constant 0 : index
    %c0_93 = arith.constant 0 : index
    %117 = vector.load %arg10[%c0_92, %c0_93] : memref<32x16xf32, #tpu.memory_space<vmem>>, vector<32x16xf32>
    tpu.vector_store %arg10[%c0_92, %c0_93], %116 {strides = array<i32>} : memref<32x16xf32, #tpu.memory_space<vmem>>, vector<32x16xf32>,
    %c8_94 = arith.constant 8 : index
    %c0_95 = arith.constant 0 : index
    %118 = vector.load %arg10[%c8_94, %c0_95] : memref<32x16xf32, #tpu.memory_space<vmem>>, vector<16x16xf32>
    %c0_96 = arith.constant 0 : index
    %c0_97 = arith.constant 0 : index
    %c0_98 = arith.constant 0 : index
    %119 = vector.load %arg9[%c0_96, %c0_97, %c0_98] : memref<1x16x16xf32, #tpu.memory_space<vmem>>, vector<1x16x16xf32>
    %120 = vector.shape_cast %119 : vector<1x16x16xf32> to vector<16x16xf32>
    %121 = vector.shape_cast %118 : vector<16x16xf32> to vector<1x16x16xf32>
    tpu.vector_store %arg9[%c0_96, %c0_97, %c0_98], %121 {strides = array<i32>} : memref<1x16x16xf32, #tpu.memory_space<vmem>>, vector<1x16x16xf32>,
    return
  }
  func.func @transform_0(%arg0: i32, %arg1: i32) -> (i32, i32, i32) {
    %c2_i32 = arith.constant 2 : i32
    %0 = arith.muli %arg1, %c2_i32 : i32
    %c1_i32 = arith.constant 1 : i32
    %1 = arith.subi %0, %c1_i32 : i32
    %c0_i32 = arith.constant 0 : i32
    %2 = arith.maxsi %1, %c0_i32 : i32
    %c0_i32_0 = arith.constant 0 : i32
    %c0_i32_1 = arith.constant 0 : i32
    return %arg0, %2, %c0_i32_0 : i32, i32, i32
  }
  func.func @transform_1(%arg0: i32, %arg1: i32) -> (i32, i32, i32) {
    %c0_i32 = arith.constant 0 : i32
    %c0_i32_0 = arith.constant 0 : i32
    return %arg0, %arg1, %c0_i32 : i32, i32, i32
  }
  func.func @transform_2(%arg0: i32, %arg1: i32) -> (i32, i32, i32) {
    %c1_i32 = arith.constant 1 : i32
    %0 = arith.addi %arg1, %c1_i32 : i32
    %c2_i32 = arith.constant 2 : i32
    %1 = arith.muli %0, %c2_i32 : i32
    %c7_i32 = arith.constant 7 : i32
    %2 = arith.minsi %1, %c7_i32 : i32
    %c0_i32 = arith.constant 0 : i32
    %c0_i32_0 = arith.constant 0 : i32
    return %arg0, %2, %c0_i32 : i32, i32, i32
  }
  func.func @transform_3(%arg0: i32, %arg1: i32) -> (i32, i32, i32) {
    %c0_i32 = arith.constant 0 : i32
    %c0_i32_0 = arith.constant 0 : i32
    %c0_i32_1 = arith.constant 0 : i32
    %c0_i32_2 = arith.constant 0 : i32
    return %c0_i32, %c0_i32_0, %c0_i32_1 : i32, i32, i32
  }
  func.func @transform_4(%arg0: i32, %arg1: i32) -> (i32, i32, i32) {
    %c0_i32 = arith.constant 0 : i32
    %c0_i32_0 = arith.constant 0 : i32
    %c0_i32_1 = arith.constant 0 : i32
    %c0_i32_2 = arith.constant 0 : i32
    return %c0_i32, %c0_i32_0, %c0_i32_1 : i32, i32, i32
  }
  func.func @transform_5(%arg0: i32, %arg1: i32) -> (i32, i32, i32) {
    %c0_i32 = arith.constant 0 : i32
    %c0_i32_0 = arith.constant 0 : i32
    %c0_i32_1 = arith.constant 0 : i32
    %c0_i32_2 = arith.constant 0 : i32
    return %c0_i32, %c0_i32_0, %c0_i32_1 : i32, i32, i32
  }
  func.func @transform_6(%arg0: i32, %arg1: i32) -> (i32, i32, i32) {
    %c0_i32 = arith.constant 0 : i32
    %c0_i32_0 = arith.constant 0 : i32
    %c0_i32_1 = arith.constant 0 : i32
    %c0_i32_2 = arith.constant 0 : i32
    return %c0_i32, %c0_i32_0, %c0_i32_1 : i32, i32, i32
  }
  func.func @transform_7(%arg0: i32, %arg1: i32) -> (i32, i32, i32) {
    %c0_i32 = arith.constant 0 : i32
    %c0_i32_0 = arith.constant 0 : i32
    return %arg0, %arg1, %c0_i32 : i32, i32, i32
  }
}

</mosaic_0001>

<bundles_post_ra>
// kernel: tpu_custom_call.1
= control target key start
LH: loop header
LB: loop body
LE: loop exit
PB: predicated region body
PF: predicated region fallthrough
CT: control target
= control target key end

     0   :  { %s3080_s0 = inlined_call_operand.hbm [shape: f32[2,64,16], index: 0, kind: input, shape index: {}]   ;;  %s3081_s1 = inlined_call_operand.hbm [shape: f32[2,64,16], index: 1, kind: input, shape index: {}]   ;;  %s3082_s2 = inlined_call_operand.hbm [shape: f32[2,64,16], index: 2, kind: input, shape index: {}]   ;;  %s3083_s3 = inlined_call_operand.hbm [shape: bf16[2,48,16], index: 3, kind: input, shape index: {}]   ;;  %s3084_s4 = inlined_call_operand.hbm [shape: f32[2,1,16], index: 4, kind: input, shape index: {}]   ;;  %s3085_s5 = inlined_call_operand.hbm [shape: bf16[2,48,16], index: 5, kind: input, shape index: {}]   ;;  %s3086_s6 = inlined_call_operand.hbm [shape: f32[2,1,16], index: 6, kind: input, shape index: {}]   ;;  %s3087_s7 = inlined_call_operand.hbm [shape: f32[2,64,16], index: 7, kind: output, shape index: {}]  }
   0x1   :  { %3114 = sst [smem:[#allocation37_spill]] %s3080_s0 }
   0x2   :  { %3115 = sst [smem:[#allocation38_spill]] %s3081_s1 }
   0x3   :  { %3116 = sst [smem:[#allocation39_spill]] %s3082_s2 }
   0x4   :  { %3117 = sst [smem:[#allocation40_spill]] %s3083_s3 }
   0x5   :  { %3118 = sst [smem:[#allocation41_spill]] %s3084_s4 }
   0x6   :  { %3119 = sst [smem:[#allocation42_spill]] %s3085_s5 }
   0x7   :  { %3120 = sst [smem:[#allocation43_spill]] %s3086_s6 }
   0x8   :  { %3121 = sst [smem:[#allocation44_spill]] %s3087_s7 }
   0x9   :  { %12 = vsyncpa [#allocation5], 0 }
   0xa   :  { %14 = vsyncpa [#allocation5 + $0x1], 0 }
   0xb   :  { %15 = vsyncpa [#allocation8], 0 }
   0xc   :  { %17 = vsyncpa [#allocation8 + $0x1], 0 }
   0xd   :  { %18 = vsyncpa [#allocation11], 0 }
   0xe   :  { %19 = vsyncpa [#allocation14], 0 }
   0xf   :  { %20 = vsyncpa [#allocation6], 0 }
  0x10   :  { %22 = vsyncpa [#allocation6 + $0x1], 0  ;;  %s2333_s24 = smov 0   ;;  %s2335_s25 = smov 0  }
  0x11   :  { %s2337_s26 = smov 0   ;;  %s2339_s27 = smov 0  }
  0x12   :  { %s2341_s28 = smov 0   ;;  %s2343_s29 = smov 0  }
  0x13   :  { %s2345_s30 = smov 0   ;;  %s2347_s8 = smov 0  }
  0x14   :  { %s2349_s9 = smov 0   ;;  %s2351_s10 = smov 0  }
  0x15   :  { %s2353_s11 = smov 0   ;;  %s2355_s12 = smov 0  }
  0x16   :  { %s2357_s13 = smov 0   ;;  %s2359_s14 = smov 0  }
  0x17 LB: > { %3122 = sst [smem:[#allocation23_spill]] %s2220_s24  ;;  %s2404_s15 = sadd.s32 4294967295, %s2272_s14   ;;  %s2272_s14 = sphi %s2359_s14, %s28_s14   ;;  %s2268_s13 = sphi %s2357_s13, %s3207_s13   ;;  %s2264_s12 = sphi %s2355_s12, %s3206_s12   ;;  %s2260_s11 = sphi %s2353_s11, %s3205_s11   ;;  %s2256_s10 = sphi %s2351_s10, %s3204_s10   ;;  %s2252_s9 = sphi %s2349_s9, %s3216_s9   ;;  %s2248_s8 = sphi %s2347_s8, %s3215_s8   ;;  %s2244_s30 = sphi %s2345_s30, %s3214_s30   ;;  %s2240_s29 = sphi %s2343_s29, %s3213_s29   ;;  %s2236_s28 = sphi %s2341_s28, %s3212_s28   ;;  %s2232_s27 = sphi %s2339_s27, %s3211_s27   ;;  %s2228_s26 = sphi %s2337_s26, %s3210_s26   ;;  %s2224_s25 = sphi %s2335_s25, %s3209_s25   ;;  %s2220_s24 = sphi %s2333_s24, %s3201_s24  }
  0x18   : > { %3123 = sst [smem:[#allocation24_spill]] %s2224_s25  ;;  %p1582_p0 = scmp.ge.s32.totalorder %s2272_s14, 1 }
  0x19   : > { %3124 = sst [smem:[#allocation25_spill]] %s2228_s26  ;;  %p3091_p1 = scmp.eq.s32.totalorder %s2404_s15, 0 }
  0x1a   : > { %3125 = sst [smem:[#allocation26_spill]] %s2232_s27  ;;  %p257_p2 = scmp.lt.s32.totalorder %s2272_s14, 9 }
  0x1b   : > { %3126 = sst [smem:[#allocation27_spill]] %s2256_s10  ;;  %s2274_s17 = smov [#allocation10]  }
  0x1c   : > { %3127 = sst [smem:[#allocation28_spill]] %s2260_s11  ;;  %p2409_p3 = pnand %p1582_p0, %p257_p2 }
  0x1d   : > { %3128 = sst [smem:[#allocation29_spill]] %s2264_s12  ;;  %s269_s18 = sshll.u32 %s2274_s17, 4  ;;  %s270_s18 = int_to_ptr.vmem [resolvable:$true] %s269_s18 }
  0x1e   : > { %3129 = sst [smem:[#allocation30_spill]] %s2268_s13  ;;  %p1732_p4 = pneg %p2409_p3 }
  0x1f   : > { %s3130_s16 = scalar_select %p2409_p3, 1, 0 }
  0x20   : > { %p2417_p5 = pnand %p1732_p4, %p3091_p1  ;;  %s2275_s20 = smov [#allocation13]  }
  0x21   : > { %3131 = sst [smem:[#allocation31_spill]] %s3130_s16  ;;  %s295_s21 = sshll.u32 %s2275_s20, 4  ;;  %s2421_s21 = int_to_ptr.vmem [resolvable:$true] %s295_s21 }
  0x22   : > { %s3132_s19 = scalar_select %p2417_p5, 1, 0 }
  0x23   : > { %s3133_s3 = sld [smem:[#allocation40_spill]]  ;;  %p2431_p7 = pneg %p2417_p5 }
  0x29   : > { %s1908_s7 = scalar_lea.hbm %s3133_s3, 768 }
  0x2a   : > { %p1909_p6 = scmp.ne.s32.totalorder %s3133_s3, %s1908_s7  ;;  %p1915_p10 = scmp.lt.u32.totalorder %s1908_s7, %s3133_s3 }
  0x2c   : > { %p1911_p8 = pnand %p2431_p7, %p1909_p6 }
  0x2e   : > { %p1912_p9 = pneg %p1911_p8 }
  0x30   : > { %p1917_p11 = pnand %p1915_p10, %p1912_p9 }
  0x32   : > { %1920 = shalt.err (!%p1917_p11)
}
  0x33   : > { %s1921_s22 = scalar_lea.vmem %s270_s18, 768  ;;  %p1929_p2 = scmp.lt.s32.totalorder %s270_s18, %s270_s18 }
  0x34   : > { %p1922_p12 = scmp.ne.s32.totalorder %s270_s18, %s1921_s22  ;;  %p1930_p4 = scmp.lt.s32.totalorder %s1921_s22, %s1921_s22 }
  0x36   : > { %p1924_p13 = pnand %p1922_p12, %p2431_p7  ;;  %p1931_p1 = por %p1930_p4, %p1929_p2 }
  0x38   : > { %p1925_p0 = pneg %p1924_p13 }
  0x3a   : > { %p1932_p3 = pnand %p1931_p1, %p1925_p0 }
  0x3c   : > { %1935 = shalt.err (!%p1932_p3)
}
  0x3d   : > { %s2276_s10 = smov 64   ;;  %s2277_s11 = smov 4  }
  0x3e   : > { %1735 = dma.hbm_to_vmem [thread:$0]  (!%p2417_p5), %s3133_s3, 768, %s270_s18, [#allocation11], %s2276_s10, %s2276_s10, %s2277_s11  }
  0x3f   : > { %s3135_s5 = sld [smem:[#allocation42_spill]] }
  0x45   : > { %s1936_s2 = scalar_lea.hbm %s3135_s5, 768 }
  0x46   : > { %p1937_p6 = scmp.ne.s32.totalorder %s3135_s5, %s1936_s2  ;;  %p1943_p8 = scmp.lt.u32.totalorder %s1936_s2, %s3135_s5 }
  0x48   : > { %p1939_p1 = pnand %p1937_p6, %p2431_p7 }
  0x4a   : > { %p1940_p3 = pneg %p1939_p1 }
  0x4c   : > { %p1945_p9 = pnand %p1943_p8, %p1940_p3 }
  0x4e   : > { %1948 = shalt.err (!%p1945_p9)
}
  0x4f   : > { %s1949_s18 = scalar_lea.vmem %s2421_s21, 768  ;;  %p1957_p13 = scmp.lt.s32.totalorder %s2421_s21, %s2421_s21 }
  0x50   : > { %p1950_p10 = scmp.ne.s32.totalorder %s2421_s21, %s1949_s18  ;;  %p1958_p0 = scmp.lt.s32.totalorder %s1949_s18, %s1949_s18 }
  0x52   : > { %p1952_p11 = pnand %p1950_p10, %p2431_p7  ;;  %p1959_p2 = por %p1958_p0, %p1957_p13 }
  0x54   : > { %p1953_p12 = pneg %p1952_p11 }
  0x56   : > { %p1960_p4 = pnand %p1959_p2, %p1953_p12 }
  0x58   : > { %1963 = shalt.err (!%p1960_p4)
}
  0x59   : > { %1741 = dma.hbm_to_vmem [thread:$0]  (!%p2417_p5), %s3135_s5, 768, %s2421_s21, [#allocation14], %s2276_s10, %s2276_s10, %s2277_s11  }
  0x5a   : > { %s1575_s25 = sadd.s32 4294967294, %s2272_s14   ;;  %s2472_s26 = sshll.u32 %s2264_s12, 1 }
  0x5b   : > { %p3101_p6 = scmp.eq.s32.totalorder %s2272_s14, 0  ;;  %p92_p1 = scmp.ne.s32.totalorder %s2240_s29, %s2236_s28 }
  0x5c   : > { %p98_p3 = scmp.ne.s32.totalorder %s2236_s28, %s2232_s27  ;;  %p244_p8 = scmp.eq.s32.totalorder %s2404_s15, 7 }
  0x5d   : > { %p250_p9 = scmp.eq.s32.totalorder %s1575_s25, 7  ;;  %p2483_p10 = por %p92_p1, %p3101_p6 }
  0x5e   : > { %p3137_p11 = scmp.eq.s32.totalorder %s2404_s15, 0  ;;  %p2493_p13 = por %p244_p8, %p92_p1 }
  0x5f   : > { %p2497_p0 = por %p250_p9, %p98_p3  ;;  %p3100_p2 = scmp.lt.s32.totalorder %s2272_s14, 8 }
  0x60   : > { %p2489_p12 = por %p98_p3, %p3137_p11  ;;  %s2503_s23 = sshll.u32 %s2268_s13, 3 }
  0x61   : > { %s3140_s10 = scalar_select %p2493_p13, 1, 0 }
  0x62   : > { %s3138_s21 = scalar_select %p2489_p12, 1, 0 }
  0x63   : > { %3141 = sst [smem:[#allocation33_spill]] %s3140_s10  ;;  %s346_s20 = sand.u32 1, %s2272_s14  }
  0x64   : > { %3139 = sst [smem:[#allocation32_spill]] %s3138_s21  ;;  %s348_s22 = sand.u32 1, %s2240_s29  }
  0x65   : > { %s3142_s11 = scalar_select %p2497_p0, 1, 0 }
  0x66   : > { %s1593_s18 = sshll.u32 %s348_s22, 4  ;;  %s356_s2 = sadd.s32 %s2503_s23, %s2472_s26 }
  0x67   : > { %3143 = sst [smem:[#allocation34_spill]] %s3142_s11  ;;  %s1596_s24 = sshll.u32 %s356_s2, 7 }
  0x68   : > { %s350_s25 = scalar_lea.vmem [#allocation7], %s1593_s18  ;;  %s3144_s1 = sld [smem:[#allocation38_spill]] }
  0x69   : > { %s359_s16 = sshll.u32 %s350_s25, 4  ;;  %p2520_p4 = pnand %p3100_p2, %p2483_p10  ;;  %s2514_s16 = int_to_ptr.vmem [resolvable:$true] %s359_s16 }
  0x6a   : > { %s2278_s22 = smov [#allocation12]   ;;  %s2526_s3 = scalar_lea.sflag [#allocation8], %s346_s20 }
  0x6b   : > { %s2524_s18 = sshll.u32 %s2278_s22, 4  ;;  %p1966_p3 = pneg %p2520_p4  ;;  %s283_s18 = int_to_ptr.vmem [resolvable:$true] %s2524_s18 }
  0x6e   : > { %s2512_s27 = scalar_lea.hbm %s3144_s1, %s1596_s24  ;;  %s1969_s24 = scalar_lea.hbm %s3144_s1, 2048 }
  0x6f   : > { %s1964_s5 = scalar_lea.hbm %s2512_s27, 256  ;;  %p1970_p10 = scmp.lt.u32.totalorder %s2512_s27, %s3144_s1 }
  0x70   : > { %p1965_p1 = scmp.ne.s32.totalorder %s2512_s27, %s1964_s5  ;;  %p1971_p11 = scmp.lt.u32.totalorder %s1969_s24, %s1964_s5 }
  0x71   : > { %p1973_p6 = scmp.lt.u32.totalorder %s1964_s5, %s2512_s27 }
  0x72   : > { %p1967_p8 = pnand %p1966_p3, %p1965_p1  ;;  %p1972_p2 = por %p1971_p11, %p1970_p10 }
  0x74   : > { %p1968_p9 = pneg %p1967_p8  ;;  %p1974_p0 = por %p1973_p6, %p1972_p2 }
  0x76   : > { %p1975_p13 = pnand %p1974_p0, %p1968_p9 }
  0x78   : > { %1978 = shalt.err (!%p1975_p13)
}
  0x79   : > { %s1979_s20 = scalar_lea.vmem %s2514_s16, 256  ;;  %s2279_s22 = smov [#allocation7]  }
  0x7a   : > { %p1980_p1 = scmp.ne.s32.totalorder %s2514_s16, %s1979_s20  ;;  %s1984_s7 = sshll.u32 %s2279_s22, 4  ;;  %s1985_s7 = int_to_ptr.vmem [resolvable:$false] %s1984_s7 }
  0x7b   : > { %s1986_s10 = scalar_lea.vmem %s1985_s7, 512  ;;  %p1987_p5 = scmp.lt.s32.totalorder %s2514_s16, %s1985_s7 }
  0x7c   : > { %p1982_p8 = pnand %p1980_p1, %p1966_p3  ;;  %p1988_p10 = scmp.lt.s32.totalorder %s1986_s10, %s1979_s20 }
  0x7e   : > { %p1983_p12 = pneg %p1982_p8  ;;  %p1989_p11 = por %p1988_p10, %p1987_p5 }
  0x80   : > { %p1990_p6 = pnand %p1989_p11, %p1983_p12 }
  0x82   : > { %1993 = shalt.err (!%p1990_p6)
}
  0x83   : > { %s2280_s5 = smov 128   ;;  %s2281_s2 = smov 8  }
  0x84   : > { %1751 = dma.hbm_to_vmem [thread:$0]  (!%p2520_p4), %s2512_s27, 256, %s2514_s16, %s2526_s3, %s2280_s5, %s2280_s5, %s2281_s2  }
  0x85   : > { %s3146_s4 = sld [smem:[#allocation41_spill]] }
  0x8b   : > { %s1994_s22 = scalar_lea.hbm %s3146_s4, 32 }
  0x8c   : > { %p1995_p5 = scmp.ne.s32.totalorder %s3146_s4, %s1994_s22  ;;  %p2001_p0 = scmp.lt.u32.totalorder %s1994_s22, %s3146_s4 }
  0x8e   : > { %p1997_p12 = pnand %p1995_p5, %p2431_p7 }
  0x90   : > { %p1998_p13 = pneg %p1997_p12 }
  0x92   : > { %p2003_p2 = pnand %p2001_p0, %p1998_p13 }
  0x94   : > { %2006 = shalt.err (!%p2003_p2)
}
  0x95   : > { %s2007_s11 = scalar_lea.vmem %s283_s18, 32  ;;  %p2015_p1 = scmp.lt.s32.totalorder %s283_s18, %s283_s18 }
  0x96   : > { %p2008_p4 = scmp.ne.s32.totalorder %s283_s18, %s2007_s11  ;;  %p2016_p8 = scmp.lt.s32.totalorder %s2007_s11, %s2007_s11 }
  0x98   : > { %p2010_p3 = pnand %p2008_p4, %p2431_p7  ;;  %p2017_p10 = por %p2016_p8, %p2015_p1 }
  0x9a   : > { %p2011_p9 = pneg %p2010_p3 }
  0x9c   : > { %p2018_p11 = pnand %p2017_p10, %p2011_p9 }
  0x9e   : > { %2021 = shalt.err (!%p2018_p11)
}
  0x9f   : > { %s2282_s27 = smov 16   ;;  %s2283_s16 = smov 1  }
  0xa0   : > { %p3147_p6 = scmp.ne.s32.totalorder %s3132_s19, 0  ;;  %s2284_s2 = smov [#allocation15]  }
  0xa1   : > { %s308_s24 = sshll.u32 %s2284_s2, 4  ;;  %s3148_s6 = sld [smem:[#allocation43_spill]]  ;;  %s309_s24 = int_to_ptr.vmem [resolvable:$true] %s308_s24 }
  0xa2   : > { %1738 = dma.hbm_to_vmem [thread:$0]  (!%p3147_p6), %s3146_s4, 32, %s283_s18, [#allocation11], %s2282_s27, %s2282_s27, %s2283_s16  }
  0xa7   : > { %s2022_s7 = scalar_lea.hbm %s3148_s6, 32 }
  0xa8   : > { %p2023_p5 = scmp.ne.s32.totalorder %s3148_s6, %s2022_s7  ;;  %p2029_p0 = scmp.lt.u32.totalorder %s2022_s7, %s3148_s6 }
  0xaa   : > { %p2025_p12 = pnand %p2023_p5, %p2431_p7 }
  0xac   : > { %p2026_p13 = pneg %p2025_p12 }
  0xae   : > { %p2031_p2 = pnand %p2029_p0, %p2026_p13 }
  0xb0   : > { %2034 = shalt.err (!%p2031_p2)
}
  0xb1   : > { %s2035_s18 = scalar_lea.vmem %s309_s24, 32  ;;  %p2043_p1 = scmp.lt.s32.totalorder %s309_s24, %s309_s24 }
  0xb2   : > { %p2036_p4 = scmp.ne.s32.totalorder %s309_s24, %s2035_s18  ;;  %p2044_p8 = scmp.lt.s32.totalorder %s2035_s18, %s2035_s18 }
  0xb4   : > { %p2038_p3 = pnand %p2036_p4, %p2431_p7  ;;  %p2045_p10 = por %p2044_p8, %p2043_p1 }
  0xb6   : > { %p2039_p9 = pneg %p2038_p3 }
  0xb8   : > { %p2046_p11 = pnand %p2045_p10, %p2039_p9 }
  0xba   : > { %2049 = shalt.err (!%p2046_p11)
}
  0xbb   : > { %1744 = dma.hbm_to_vmem [thread:$0]  (!%p3147_p6), %s3148_s6, 32, %s309_s24, [#allocation14], %s2282_s27, %s2282_s27, %s2283_s16  }
  0xbc   : > { %s37_s17 = sadd.s32 1, %s2264_s12  ;;  %s40_s21 = sadd.s32 1, %s2268_s13 }
  0xbd   : > { %p38_p7 = scmp.ge.s32.totalorder %s37_s17, 4  ;;  %s1577_s2 = sadd.s32 4294967295, %s2472_s26 }
  0xbe   : > { %p46_p5 = scmp.gt.s32.totalorder %s1577_s2, 0  ;;  %s57_s19 = sadd.s32 1, %s2252_s9 }
  0xbf   : > { %s3218_s17 = smov (%p38_p7, %s37_s17), 0  ;;  %s3220_s21 = smov (!%p38_p7, %s40_s21), %s2268_s13 }
  0xc0   : > { %3149 = sst [smem:[#allocation35_spill]] %s3218_s17  ;;  %s3222_s2 = smov (!%p46_p5, %s1577_s2), 0 }
  0xc1   : > { %p42_p12 = scmp.ge.s32.totalorder %s3220_s21, 2  ;;  %s1578_s27 = sshll.u32 %s3218_s17, 1 }
  0xc2   : > { %s1579_s16 = sadd.s32 4294967295, %s1578_s27  ;;  %p64_p6 = scmp.ne.s32.totalorder %s2252_s9, %s2248_s8 }
  0xc3   : > { %s3224_s21 = smov (%p42_p12, %s3220_s21), 0  ;;  %p50_p13 = scmp.gt.s32.totalorder %s1579_s16, 0 }
  0xc4   : > { %3150 = sst [smem:[#allocation36_spill]] %s3224_s21  ;;  %p3151_p0 = scmp.eq.s32.totalorder %s2272_s14, 0 }
  0xc5   : > { %s2611_s25 = ssub.s32 %s2268_s13, %s3224_s21  ;;  %p70_p4 = scmp.ne.s32.totalorder %s2248_s8, %s2244_s30 }
  0xc6   : > { %p2605_p2 = por %p3151_p0, %p64_p6  ;;  %s3226_s16 = smov (!%p50_p13, %s1579_s16), 0 }
  0xc7   : > { %p3153_p3 = scmp.eq.s32.totalorder %s2404_s15, 0  ;;  %s81_s7 = ssub.s32 %s2264_s12, %s3218_s17 }
  0xc8   : > { %s53_s20 = ssub.s32 %s3222_s2, %s3226_s16  ;;  %s82_s10 = sor.u32 %s81_s7, %s2611_s25 }
  0xc9   : > { %p2617_p9 = por %p3153_p3, %p70_p4  ;;  %s54_s11 = sor.u32 %s53_s20, %s2611_s25 }
  0xca   : > { %p83_p1 = scmp.eq.s32.totalorder %s82_s10, 0  ;;  %p55_p8 = scmp.eq.s32.totalorder %s54_s11, 0 }
  0xcb   : > { %s2625_s18 = sadd.s32 2, %s1578_s27  ;;  %s3155_s1 = sadd.s32 1, %s2240_s29 }
  0xcc   : > { %s2630_s5 = scalar_select %p83_p1, %s2240_s29, %s3155_s1  }
  0xcd   : > { %s2633_s30 = scalar_select %p55_p8, %s2252_s9, %s57_s19  }
  0xce   : > { %s322_s4 = sand.u32 1, %s2252_s9   ;;  %s335_s21 = sadd.s32 %s2503_s23, %s3222_s2 }
  0xcf   : > { %s1588_s6 = sshll.u32 %s322_s4, 3  ;;  %s1592_s17 = sshll.u32 %s335_s21, 7 }
  0xd0   : > { %s326_s16 = scalar_lea.vmem [#allocation4], %s1588_s6  ;;  %s3156_s0 = sld [smem:[#allocation37_spill]] }
  0xd1   : > { %s339_s7 = sshll.u32 %s326_s16, 4  ;;  %p3157_p11 = scmp.lt.s32.totalorder %s2272_s14, 8  ;;  %s2643_s7 = int_to_ptr.vmem [resolvable:$true] %s339_s7 }
  0xd2   : > { %s323_s6 = scalar_lea.sflag [#allocation5], %s322_s4 }
  0xd3   : > { %p2649_p7 = pnand %p3157_p11, %p2605_p2 }
  0xd5   : > { %p2052_p12 = pneg %p2649_p7 }
  0xd6   : > { %s2641_s20 = scalar_lea.hbm %s3156_s0, %s1592_s17  ;;  %s2055_s17 = scalar_lea.hbm %s3156_s0, 2048 }
  0xd7   : > { %s2050_s21 = scalar_lea.hbm %s2641_s20, 128  ;;  %p2056_p0 = scmp.lt.u32.totalorder %s2641_s20, %s3156_s0 }
  0xd8   : > { %p2051_p5 = scmp.ne.s32.totalorder %s2641_s20, %s2050_s21  ;;  %p2057_p2 = scmp.lt.u32.totalorder %s2055_s17, %s2050_s21 }
  0xd9   : > { %p2059_p3 = scmp.lt.u32.totalorder %s2050_s21, %s2641_s20 }
  0xda   : > { %p2053_p6 = pnand %p2052_p12, %p2051_p5  ;;  %p2058_p4 = por %p2057_p2, %p2056_p0 }
  0xdc   : > { %p2054_p13 = pneg %p2053_p6  ;;  %p2060_p1 = por %p2059_p3, %p2058_p4 }
  0xde   : > { %p2061_p8 = pnand %p2060_p1, %p2054_p13 }
  0xe0   : > { %2064 = shalt.err (!%p2061_p8)
}
  0xe1   : > { %s2065_s4 = scalar_lea.vmem %s2643_s7, 128  ;;  %s2285_s24 = smov [#allocation4]  }
  0xe2   : > { %p2066_p11 = scmp.ne.s32.totalorder %s2643_s7, %s2065_s4  ;;  %s2070_s10 = sshll.u32 %s2285_s24, 4  ;;  %s2071_s10 = int_to_ptr.vmem [resolvable:$false] %s2070_s10 }
  0xe3   : > { %s2072_s11 = scalar_lea.vmem %s2071_s10, 256  ;;  %p2073_p10 = scmp.lt.s32.totalorder %s2643_s7, %s2071_s10 }
  0xe4   : > { %p2068_p5 = pnand %p2066_p11, %p2052_p12  ;;  %p2074_p0 = scmp.lt.s32.totalorder %s2072_s11, %s2065_s4 }
  0xe6   : > { %p2069_p6 = pneg %p2068_p5  ;;  %p2075_p2 = por %p2074_p0, %p2073_p10 }
  0xe8   : > { %p2076_p4 = pnand %p2075_p2, %p2069_p6 }
  0xea   : > { %2079 = shalt.err (!%p2076_p4)
}
  0xeb   : > { %s3159_s1 = sld [smem:[#allocation25_spill]]  ;;  %s3160_s16 = sld [smem:[#allocation24_spill]] }
  0xec   : > { %s3161_s21 = sld [smem:[#allocation23_spill]]  ;;  %s1643_s12 = sadd.s32 2, %s2472_s26 }
  0xed   : > { %1748 = dma.hbm_to_vmem [thread:$0]  (!%p2649_p7), %s2641_s20, 128, %s2643_s7, %s323_s6  }
  0xee   : > { %p110_p10 = scmp.lt.s32.totalorder %s1643_s12, 7  ;;  %p3162_p13 = scmp.lt.s32.totalorder %s2625_s18, 7 }
  0xef   : > { %p3163_p3 = scmp.eq.s32.totalorder %s2272_s14, 0  ;;  %p3165_p7 = scmp.eq.s32.totalorder %s2404_s15, 0 }
  0xf0   : > { %s3228_s18 = smov (!%p3162_p13, %s2625_s18), 7  ;;  %s3230_s12 = smov (!%p110_p10, %s1643_s12), 7 }
  0xf1   : > { %s121_s13 = sadd.s32 1, %s3159_s1  ;;  %p128_p12 = scmp.ne.s32.totalorder %s3159_s1, %s3160_s16 }
  0xf2   : > { %p134_p8 = scmp.ne.s32.totalorder %s3160_s16, %s3161_s21  ;;  %s117_s17 = ssub.s32 %s3230_s12, %s3228_s18 }
  0xf3   : > { %p2687_p1 = por %p128_p12, %p3163_p3  ;;  %s371_s2 = sand.u32 1, %s3159_s1  }
  0xf4   : > { %s118_s27 = sor.u32 %s117_s17, %s2611_s25  ;;  %p2697_p11 = por %p134_p8, %p3165_p7 }
  0xf5   : > { %p119_p5 = scmp.eq.s32.totalorder %s118_s27, 0  ;;  %s1597_s7 = sshll.u32 %s371_s2, 3 }
  0xf6   : > { %s3166_s26 = scalar_select %p2697_p11, 1, 0 }
  0xf7   : > { %s382_s20 = sadd.s32 %s2503_s23, %s3230_s12  ;;  %s3232_s1 = smov (!%p119_p5, %s3159_s1), %s121_s13 }
  0xf8   : > { %s1600_s6 = sshll.u32 %s382_s20, 7  ;;  %s373_s4 = scalar_lea.vmem [#allocation9], %s1597_s7 }
  0xf9   : > { %s386_s24 = sshll.u32 %s373_s4, 4  ;;  %s3167_s0 = sld [smem:[#allocation39_spill]]  ;;  %s2710_s24 = int_to_ptr.vmem [resolvable:$true] %s386_s24 }
  0xfa   : > { %p3168_p6 = scmp.lt.s32.totalorder %s2272_s14, 8 }
  0xfc   : > { %p2716_p0 = pnand %p3168_p6, %p2687_p1 }
  0xfe   : > { %p2082_p4 = pneg %p2716_p0 }
  0xff   : > { %s2708_s16 = scalar_lea.hbm %s3167_s0, %s1600_s6  ;;  %s2085_s12 = scalar_lea.hbm %s3167_s0, 2048 }
 0x100   : > { %s2080_s25 = scalar_lea.hbm %s2708_s16, 128  ;;  %p2086_p13 = scmp.lt.u32.totalorder %s2708_s16, %s3167_s0 }
 0x101   : > { %p2081_p2 = scmp.ne.s32.totalorder %s2708_s16, %s2080_s25  ;;  %p2087_p3 = scmp.lt.u32.totalorder %s2085_s12, %s2080_s25 }
 0x102   : > { %p2089_p8 = scmp.lt.u32.totalorder %s2080_s25, %s2708_s16 }
 0x103   : > { %p2083_p10 = pnand %p2082_p4, %p2081_p2  ;;  %p2088_p1 = por %p2087_p3, %p2086_p13 }
 0x105   : > { %p2084_p12 = pneg %p2083_p10  ;;  %p2090_p7 = por %p2089_p8, %p2088_p1 }
 0x107   : > { %p2091_p5 = pnand %p2090_p7, %p2084_p12 }
 0x109   : > { %2094 = shalt.err (!%p2091_p5)
}
 0x10a   : > { %s2095_s17 = scalar_lea.vmem %s2710_s24, 128  ;;  %s2286_s2 = smov [#allocation9]  }
 0x10b   : > { %p2096_p6 = scmp.ne.s32.totalorder %s2710_s24, %s2095_s17  ;;  %s2100_s27 = sshll.u32 %s2286_s2, 4  ;;  %s2101_s27 = int_to_ptr.vmem [resolvable:$false] %s2100_s27 }
 0x10c   : > { %s2102_s7 = scalar_lea.vmem %s2101_s27, 256  ;;  %p2103_p11 = scmp.lt.s32.totalorder %s2710_s24, %s2101_s27 }
 0x10d   : > { %p2098_p2 = pnand %p2096_p6, %p2082_p4  ;;  %p2104_p13 = scmp.lt.s32.totalorder %s2102_s7, %s2095_s17 }
 0x10f   : > { %p2099_p10 = pneg %p2098_p2  ;;  %p2105_p3 = por %p2104_p13, %p2103_p11 }
 0x111   : > { %p2106_p1 = pnand %p2105_p3, %p2099_p10 }
 0x113   : > { %2109 = shalt.err (!%p2106_p1)
}
 0x114   : > { %1754 = dma.hbm_to_vmem [thread:$0]  (!%p2716_p0), %s2708_s16, 128, %s2710_s24, %s2526_s3  }
 0x115   : > { %s3170_s20 = sld [smem:[#allocation31_spill]] }
 0x11b   : > { %p3171_p12 = scmp.ne.s32.totalorder %s3170_s20, 0 }
 0x11c   : > { %s397_s6 = sand.u32 (!%p3171_p12), 1, %s2248_s8  }
 0x11d   : > { %395 = sbr.rel (%p3171_p12) target bundleno = 1851 (0x73b), region = 48  ;;  %s2749_s4 = sshll.u32 (!%p3171_p12), %s397_s6, 3 }
 0x11e   : > { %s398_s10 = scalar_lea.sflag (!%p3171_p12), [#allocation5], %s397_s6  ;;  %s401_s11 = scalar_lea.vmem (!%p3171_p12), [#allocation4], %s2749_s4 }
 0x124   : > { %2195 = dma.done.wait (%p2617_p9), %s398_s10, 128  }
 0x125   : > { %2197 = vsyncadd (%p2617_p9), %s398_s10, 4294967168  ;;  %s3172_s3 = sld [smem:[#allocation32_spill]]  ;;  %s406_s24 = sand.u32 1, %s2404_s15  }
 0x126   : > { %s408_s16 = sand.u32 1, %s2236_s28   ;;  %s407_s25 = scalar_lea.sflag [#allocation8], %s406_s24 }
 0x127   : > { %s2760_s23 = sshll.u32 %s408_s16, 4 }
 0x128   : > { %s410_s18 = scalar_lea.vmem [#allocation7], %s2760_s23 }
 0x12b   : > { %p3173_p11 = scmp.ne.s32.totalorder %s3172_s3, 0 }
 0x12d   : > { %2199 = dma.done.wait (%p3173_p11), %s407_s25, 256  }
 0x12e   : > { %2201 = vsyncadd (%p3173_p11), %s407_s25, 4294967040  ;;  %s3174_s21 = sld [smem:[#allocation24_spill]]  ;;  %p3175_p9 = scmp.ne.s32.totalorder %s3166_s26, 0 }
 0x134   : > { %s417_s22 = sand.u32 1, %s3174_s21  }
 0x135   : > { %s2768_s12 = sshll.u32 %s417_s22, 3 }
 0x136   : > { %s419_s13 = scalar_lea.vmem [#allocation9], %s2768_s12 }
 0x137   : > { %2203 = dma.done.wait (%p3175_p9), %s407_s25, 128  }
 0x138   : > { %2205 = vsyncadd (%p3175_p9), %s407_s25, 4294967168  ;;  %p3176_p0 = scmp.eq.s32.totalorder %s2404_s15, 0 }
 0x13a   : > { %2207 = dma.done.wait (%p3176_p0), [#allocation11], 800   ;;  %p3177_p4 = pmov %p3176_p0 }
 0x13b   : > { %p3178_p8 = pmov %p3176_p0 }
 0x13c   : > { %2209 = vsyncadd (%p3177_p4), [#allocation11], 4294966496 }
 0x13d   : > { %2211 = dma.done.wait (%p3178_p8), [#allocation14], 800   ;;  %p3179_p7 = pmov %p3176_p0 }
 0x13e   : > { %s3180_s19 = sld [smem:[#allocation27_spill]]  ;;  %v500_v0 = vlaneseq  ;;  %vm498_vm0 = vcmask 130052   ;;  %vm496_vm1 = vcmask 125952   ;;  %v2287_v3 = vmov 0   ;;  %v487_v9 = vld [vmem:[%s401_s11] sm:$0xff]  ;;  %v490_v10 = vld [vmem:[%s410_s18] sm:$0xff] }
 0x13f   : > { %2213 = vsyncadd (%p3179_p7), [#allocation14], 4294966496  ;;  %499 = vst.msk [vmem:[#allocation3 + $0x10] sm:$0xf0] %vm498_vm0, %v2287_v3  ;;  %vm488_vm2 = vcmask 130048   ;;  %v491_v11 = vld [vmem:[%s410_s18 + $0x8] sm:$0xff] }
 0x140   : > { %v501_v1 = vshrl.u32 %v500_v0, 7  ;;  %497 = vst.msk [vmem:[#allocation3] sm:$0xf] %vm496_vm1, %v2287_v3  ;;  %v494_v13 = vld [vmem:[%s419_s13] sm:$0xff]  ;;  %v1896_v40 = vld [vmem:[#allocation10] sm:$0xff]   ;;  %v1897_v49 = vld [vmem:[#allocation10 + $0x8] sm:$0xff]  }
 0x141   : > { %489 = vst.msk [vmem:[#allocation2] sm:$0xff] %vm488_vm2, %v487_v9  ;;  %492 = vst.msk [vmem:[#allocation2 + $0x8] sm:$0xff] %vm488_vm2, %v490_v10  ;;  %1668 = vmatprep.subr.bf16.mxu0 %v1896_v40  ;;  %s2288_s15 = smov 32   ;;  %v1898_v60 = vld [vmem:[#allocation10 + $0x10] sm:$0xff]   ;;  %s2289_s26 = smov 16  }
 0x142   : > { %v502_v4 = vadd.s32 8, %v501_v1  ;;  %v503_v5 = vadd.s32 16, %v501_v1  ;;  %v504_v12 = vadd.s32 24, %v501_v1  ;;  %493 = vst.msk [vmem:[#allocation2 + $0x10] sm:$0xff] %vm488_vm2, %v491_v11  ;;  %495 = vst.msk [vmem:[#allocation2 + $0x18] sm:$0xff] %vm488_vm2, %v494_v13  ;;  %1669 = vmatpush3.bf16.msra.mxu0 %v1896_v40  ;;  %v1905_v22 = vld [vmem:[#allocation13 + $0x18] sm:$0xff]  }
 0x143   : > { %1670 = vmatprep.subr.bf16.mxu0 %v1897_v49  ;;  %v1612_v40 = vld [vmem:[#allocation12] ss:$0 sm:$0xff]  ;;  %s3193_s27 = sld [smem:[#allocation28_spill]]  ;;  %s3194_s6 = sld [smem:[#allocation33_spill]] }
 0x144   : > { %s1610_s17 = sshll.u32 %s3180_s19, 4  ;;  %s1637_s7 = sshll.u32 %s3180_s19, 1 }
 0x145   : > { %s1611_s2 = sadd.s32 4294967288, %s1610_s17  ;;  %s475_s11 = scalar_lea.vmem [#allocation16], %s2760_s23 }
 0x146   : > { %v507_v2 = vstv %s1611_s2  ;;  %1671 = vmatpush3.bf16.msra.mxu0 %v1897_v49  ;;  %s1399_s3 = sshll.u32 %s475_s11, 4  ;;  %s3195_s18 = sld [smem:[#allocation44_spill]]  ;;  %s2999_s3 = int_to_ptr.vmem [resolvable:$true] %s1399_s3 }
 0x147   : > { %v508_v6 = vadd.s32 %v507_v2, %v501_v1  ;;  %v509_v7 = vadd.s32 %v507_v2, %v502_v4  ;;  %v510_v8 = vadd.s32 %v507_v2, %v503_v5  ;;  %v511_v14 = vadd.s32 %v507_v2, %v504_v12  ;;  %1672 = vmatprep.subr.bf16.mxu0 %v1898_v60  ;;  %s3004_s22 = scalar_lea.sflag [#allocation6], %s408_s16  ;;  %s2110_s23 = scalar_lea.vmem %s2999_s3, 256 }
 0x148   : > { %v2796_v16 = vld [vmem:[#allocation2] sm:$0xff]  ;;  %v2798_v17 = vld [vmem:[#allocation2 + $0x8] sm:$0xff]  ;;  %p2111_p5 = scmp.ne.s32.totalorder %s2999_s3, %s2110_s23  ;;  %s2290_s12 = smov [#allocation16]  }
 0x149   : > { %vm512_vm3 = vcmp.ge.s32.totalorder %v508_v6, 0  ;;  %vm516_vm4 = vcmp.lt.s32.totalorder %v508_v6, 50  ;;  %vm513_vm5 = vcmp.ge.s32.totalorder %v509_v7, 0  ;;  %vm514_vm6 = vcmp.ge.s32.totalorder %v510_v8, 0  ;;  %v2800_v18 = vld [vmem:[#allocation2 + $0x10] sm:$0xff]  ;;  %v2806_v20 = vld [vmem:[#allocation2 + $0x18] sm:$0xff] }
 0x14a   : > { %vm517_vm7 = vcmp.lt.s32.totalorder %v509_v7, 50  ;;  %vm518_vm8 = vcmp.lt.s32.totalorder %v510_v8, 50  ;;  %vm2792_vm9 = vmand %vm512_vm3, %vm516_vm4  ;;  %vm515_vm10 = vcmp.ge.s32.totalorder %v511_v14, 0  ;;  %vm519_vm11 = vcmp.lt.s32.totalorder %v511_v14, 50  ;;  %1673 = vmatpush3.bf16.msra.mxu0 %v1898_v60  ;;  %s1638_s20 = sshll.u32 %s3193_s27, 3  ;;  %p3196_p6 = scmp.ne.s32.totalorder %s3194_s6, 0 }
 0x14b   : > { %vm2802_vm12 = vmand %vm513_vm5, %vm517_vm7  ;;  %vm528_vm13 = vcmp.ge.f32.partialorder %v2796_v16, 0.0  ;;  %vm529_vm14 = vcmp.ge.f32.partialorder %v2798_v17, 0.0  ;;  %vm530_vm15 = vcmp.ge.f32.partialorder %v2800_v18, 0.0  ;;  %v532_v21 = vmul.f32 0.1, %v2796_v16  ;;  %s1396_s4 = sadd.s32 %s1638_s20, %s1637_s7  ;;  %s2114_s13 = sshll.u32 %s2290_s12, 4  ;;  %s2115_s13 = int_to_ptr.vmem [resolvable:$false] %s2114_s13 }
 0x14c   : > { %vm2813_vm3 = vmand %vm514_vm6, %vm518_vm8  ;;  %vm531_vm4 = vcmp.ge.f32.partialorder %v2806_v20, 0.0  ;;  %v533_v23 = vmul.f32 0.1, %v2798_v17  ;;  %v534_v24 = vmul.f32 0.1, %v2800_v18  ;;  %vm556_vm6 = vcmask 1043456   ;;  %p2112_p2 = pnand %p2111_p5, %p3196_p6  ;;  %p2117_p13 = scmp.lt.s32.totalorder %s2999_s3, %s2115_s13 }
 0x14d   : > { %vm2821_vm5 = vmand %vm515_vm10, %vm519_vm11  ;;  %v535_v26 = vmul.f32 0.1, %v2806_v20  ;;  %v536_v27 = vsel %vm528_vm13, %v2796_v16, %v532_v21  ;;  %vm604_vm7 = vcmask 1046528   ;;  %vm571_vm8 = vsmask.f32 7424  ;;  %s1639_s10 = sshll.u32 %s1396_s4, 7 }
 0x14e   : > { %v537_v28 = vsel %vm529_vm14, %v2798_v17, %v533_v23  ;;  %v538_v29 = vsel %vm530_vm15, %v2800_v18, %v534_v24  ;;  %v548_v30 = vsel %vm2792_vm9, %v536_v27, 0.0  ;;  %vm623_vm10 = vcmask 261120   ;;  %s2997_s21 = scalar_lea.hbm %s3195_s18, %s1639_s10  ;;  %p2113_p10 = pneg %p2112_p2 }
 0x14f   : > { %v539_v31 = vsel %vm531_vm4, %v2806_v20, %v535_v26  ;;  %v549_v32 = vsel %vm2802_vm12, %v537_v28, 0.0  ;;  %v550_v33 = vsel %vm2813_vm3, %v538_v29, 0.0  ;;  %vm3113_vm11 = vsmask.f32 4352  ;;  %s2116_s19 = scalar_lea.vmem %s2115_s13, 512 }
 0x150   : > { %v551_v34 = vsel %vm2821_vm5, %v539_v31, 0.0  ;;  %v552_v35 = vpack.c.bf16 %v549_v32, %v548_v30  ;;  %vm685_vm13 = vcmask 392192   ;;  %p2118_p3 = scmp.lt.s32.totalorder %s2116_s19, %s2110_s23 }
 0x151   : > { %v553_v36 = vpack.c.bf16 %v551_v34, %v550_v33 }
 0x152   : > { %v557_v37 = vrot.slane %v552_v35, 4  ;;  %p2119_p1 = por %p2118_p3, %p2117_p13 }
 0x153   : > { %v558_v38 = vrot.slane %v553_v36, 4 }
 0x154   : > { %563 = vst.msk [vmem:[#allocation3] sm:$0xf0] %vm498_vm0, %v557_v37  ;;  %p2120_p12 = pnand %p2119_p1, %p2113_p10 }
 0x155   : > { %v559_v39 = vsel %vm556_vm6, %v557_v37, %v558_v38  ;;  %565 = vst.msk [vmem:[#allocation3 + $0x10] sm:$0xf] %vm496_vm1, %v558_v38 }
 0x156   : > { %564 = vst.msk [vmem:[#allocation3 + $0x8] sm:$0xff] %vm488_vm2, %v559_v39 }
 0x15b   : > { %v569_v41 = vld [vmem:[#allocation3] sm:$0xf0] }
 0x15c   : > { %v605_v42 = vrot.slane %v569_v41, 1  ;;  %v573_v43 = vshrl.u32 %v569_v41, 16  ;;  %v575_v44 = vshll.u32 %v569_v41, 16  ;;  %v568_v45 = vld [vmem:[#allocation3 + $0x10] sm:$0xf] }
 0x15d   : > { %v567_v46 = vld [vmem:[#allocation3 + $0x8] sm:$0xff]  ;;  %v588_v47 = vshll.u32 %v568_v45, 16  ;;  %v592_v48 = vshrl.u32 %v568_v45, 16  ;;  %v570_v59 = vld [vmem:[#allocation3 + $0x10] sm:$0x1f] }
 0x15e   : > { %v606_v50 = vrot.slane %v567_v46, 1  ;;  %v577_v51 = vrot.slane %v575_v44, 1  ;;  %v580_v52 = vshll.u32 %v567_v46, 16  ;;  %v584_v53 = vshrl.u32 %v567_v46, 16  ;;  %v566_v3 = vld [vmem:[#allocation3] sm:$0xf8] }
 0x15f   : > { %v590_v54 = vrot.slane %v588_v47, 1  ;;  %v608_v0 = vrot.slane %v570_v59, 1 }
 0x160   : > { %v607_v55 = vsel %vm604_vm7, %v605_v42, %v606_v50  ;;  %v578_v56 = vor.u32 %v577_v51, %v573_v43  ;;  %v582_v57 = vrot.slane %v580_v52, 1 }
 0x161   : > { %610 = vrot.lane.b32.xlu1 %v607_v55, %s2288_s15  ;;  %v594_v58 = vor.u32 %v592_v48, %v590_v54  ;;  %v609_v1 = vsel %vm604_vm7, %v606_v50, %v608_v0 }
 0x162   : > { %v583_v61 = vsel %vm571_vm8, %v578_v56, %v582_v57  ;;  %v586_v62 = vor.u32 %v584_v53, %v582_v57 }
 0x163   : > { %595 = vrot.lane.b32.xlu0 %v583_v61, %s2289_s26 }
 0x164   : > { %v591_v63 = vsel %vm571_vm8, %v586_v62, %v590_v54 }
 0x165   : > { %599 = vrot.lane.b32.xlu1 %v594_v58, %s2289_s26 }
 0x167   : > { %597 = vrot.lane.b32.xlu0 %v591_v63, %s2289_s26 }
 0x169   : > { %614 = vrot.lane.b32.xlu1 %v608_v0, %s2288_s15 }
 0x16b   : > { %612 = vrot.lane.b32.xlu0 %v609_v1, %s2288_s15 }
 0x1d3   : > { %v611_v2 = vpop.permute.xlu1 %610 }
 0x1d5   : > { %v596_v4 = vpop.permute.xlu0 %595 }
 0x1d6   : > { %v618_v5 = vsel %vm488_vm2, %v566_v3, %v596_v4 }
 0x1d7   : > { %v625_v6 = vsel %vm623_vm10, %v618_v5, %v611_v2  ;;  %v600_v7 = vpop.permute.xlu1 %599  ;;  %v1899_v2 = vld [vmem:[#allocation13] sm:$0xff]  }
 0x1d8   : > { %v622_v8 = vsel %vm488_vm2, %v568_v45, %v600_v7  ;;  %v644_v10 = vshrl.u32 %v625_v6, 16  ;;  %v647_v11 = vshll.u32 %v625_v6, 16  ;;  %1678 = vmatprep.subr.bf16.mxu1 %v1899_v2 }
 0x1d9   : > { %v598_v9 = vpop.permute.xlu0 %597  ;;  %1679 = vmatpush3.bf16.msra.mxu1 %v1899_v2  ;;  %v1618_v2 = vld [vmem:[#allocation15] ss:$0 sm:$0xff] }
 0x1da   : > { %v620_v14 = vsel %vm488_vm2, %v567_v46, %v598_v9  ;;  %v646_v26 = vrot.slane %v644_v10, 3  ;;  %v649_v27 = vrot.slane %v647_v11, 4 }
 0x1db   : > { %v615_v12 = vpop.permute.xlu1 %614 }
 0x1dc   : > { %v629_v13 = vsel %vm623_vm10, %v622_v8, %v615_v12  ;;  %v650_v36 = vor.u32 %v649_v27, %v646_v26 }
 0x1dd   : > { %v659_v21 = vshrl.u32 %v629_v13, 16  ;;  %v662_v23 = vshll.u32 %v629_v13, 16  ;;  %v613_v24 = vpop.permute.xlu0 %612  ;;  %v1900_v13 = vld [vmem:[#allocation13 + $0x8] sm:$0xff]  }
 0x1de   : > { %v627_v28 = vsel %vm623_vm10, %v620_v14, %v613_v24  ;;  %1680 = vmatprep.subr.bf16.mxu1 %v1900_v13 }
 0x1df   : > { %v661_v29 = vrot.slane %v659_v21, 3  ;;  %v664_v30 = vrot.slane %v662_v23, 4  ;;  %v651_v31 = vshrl.u32 %v627_v28, 16  ;;  %v654_v32 = vshll.u32 %v627_v28, 16  ;;  %1681 = vmatpush3.bf16.msra.mxu1 %v1900_v13 }
 0x1e1   : > { %v653_v33 = vrot.slane %v651_v31, 3  ;;  %v656_v34 = vrot.slane %v654_v32, 4  ;;  %v665_v35 = vor.u32 %v664_v30, %v661_v29  ;;  %v1901_v29 = vld [vmem:[#allocation13 + $0x10] sm:$0xff]  }
 0x1e2   : > { %1682 = vmatprep.subr.bf16.mxu1 %v1901_v29 }
 0x1e3   : > { %v657_v37 = vor.u32 %v656_v34, %v653_v33  ;;  %1683 = vmatpush3.bf16.msra.mxu1 %v1901_v29 }
 0x1e4   : > { %1698 = vmatprep.subr.bf16.mxu1 %v1905_v22 }
 0x1e5   : > { %v658_v38 = vsel %vm3113_vm11, %v650_v36, %v657_v37  ;;  %v666_v39 = vsel %vm3113_vm11, %v657_v37, %v665_v35 }
 0x1e6   : > { %1674 = vmatprep.mubr.msk.bf16.mxu0 %vm685_vm13, %v658_v38 }
 0x1e7   : > { %1675 = vmatmul.mubr.msk.bf16.vlgmr.msra.gmra.mrb[0].mxu0 %vm685_vm13, %v666_v39 }
 0x2ba   : > { %v1676_v41 = vpop.f32.mrb[0].mxu0 }
 0x2bb   : > { %v735_v42 = vadd.f32 %v1676_v41, %v1612_v40  ;;  %v726_v43 = vpop.f32.mrb[1].mxu0 }
 0x2bc   : > { %v727_v44 = vadd.f32 %v1612_v40, %v726_v43  ;;  %v1677_v45 = vpop.f32.mrb[2].mxu0 }
 0x2bd   : > { %vm743_vm14 = vcmp.ge.f32.partialorder %v735_v42, 0.0  ;;  %v747_v46 = vmul.f32 0.1, %v735_v42  ;;  %v738_v47 = vadd.f32 %v1677_v45, %v1612_v40  ;;  %v729_v48 = vpop.f32.mrb[3].mxu0 }
 0x2be   : > { %vm741_vm15 = vcmp.ge.f32.partialorder %v727_v44, 0.0  ;;  %v745_v49 = vmul.f32 0.1, %v727_v44  ;;  %v730_v50 = vadd.f32 %v1612_v40, %v729_v48 }
 0x2bf   : > { %v751_v51 = vsel %vm743_vm14, %v735_v42, %v747_v46  ;;  %vm744_vm4 = vcmp.ge.f32.partialorder %v738_v47, 0.0  ;;  %v748_v52 = vmul.f32 0.1, %v738_v47 }
 0x2c0   : > { %v749_v53 = vsel %vm741_vm15, %v727_v44, %v745_v49  ;;  %vm742_vm11 = vcmp.ge.f32.partialorder %v730_v50, 0.0  ;;  %v746_v54 = vmul.f32 0.1, %v730_v50  ;;  %v755_v56 = vsel %vm2813_vm3, %v751_v51, 0.0 }
 0x2c1   : > { %v752_v55 = vsel %vm744_vm4, %v738_v47, %v748_v52  ;;  %v753_v59 = vsel %vm2792_vm9, %v749_v53, 0.0 }
 0x2c2   : > { %v756_v57 = vsel %vm2821_vm5, %v752_v55, 0.0  ;;  %v750_v58 = vsel %vm742_vm11, %v730_v50, %v746_v54  ;;  %vm3189_vm11 = vsmask.f32 4352 }
 0x2c3   : > { %v758_v60 = vpack.c.bf16 %v756_v57, %v755_v56  ;;  %v754_v61 = vsel %vm2802_vm12, %v750_v58, 0.0  ;;  %vm3190_vm14 = vmmov %vm3189_vm11 }
 0x2c4   : > { %v757_v62 = vpack.c.bf16 %v754_v61, %v753_v59 }
 0x2c5   : > { %v762_v63 = vrot.slane %v758_v60, 4 }
 0x2c6   : > { %v761_v0 = vrot.slane %v757_v62, 4 }
 0x2c7   : > { %769 = vst.msk [vmem:[#allocation3 + $0x10] sm:$0xf] %vm496_vm1, %v762_v63 }
 0x2c8   : > { %v763_v1 = vsel %vm556_vm6, %v761_v0, %v762_v63  ;;  %767 = vst.msk [vmem:[#allocation3] sm:$0xf0] %vm498_vm0, %v761_v0 }
 0x2c9   : > { %768 = vst.msk [vmem:[#allocation3 + $0x8] sm:$0xff] %vm488_vm2, %v763_v1 }
 0x2ce   : > { %v772_v3 = vld [vmem:[#allocation3 + $0x10] sm:$0xf] }
 0x2cf   : > { %v773_v4 = vld [vmem:[#allocation3] sm:$0xf0]  ;;  %v791_v5 = vshll.u32 %v772_v3, 16  ;;  %v795_v11 = vshrl.u32 %v772_v3, 16  ;;  %v774_v32 = vld [vmem:[#allocation3 + $0x10] sm:$0x1f] }
 0x2d0   : > { %v771_v6 = vld [vmem:[#allocation3 + $0x8] sm:$0xff]  ;;  %v807_v7 = vrot.slane %v773_v4, 1  ;;  %v778_v8 = vshll.u32 %v773_v4, 16  ;;  %v776_v14 = vshrl.u32 %v773_v4, 16  ;;  %v810_v34 = vrot.slane %v774_v32, 1 }
 0x2d1   : > { %v808_v9 = vrot.slane %v771_v6, 1  ;;  %v793_v10 = vrot.slane %v791_v5, 1  ;;  %v783_v12 = vshll.u32 %v771_v6, 16  ;;  %v787_v27 = vshrl.u32 %v771_v6, 16  ;;  %v770_v39 = vld [vmem:[#allocation3] sm:$0xf8] }
 0x2d2   : > { %v780_v21 = vrot.slane %v778_v8, 1 }
 0x2d3   : > { %v809_v23 = vsel %vm604_vm7, %v807_v7, %v808_v9  ;;  %v797_v24 = vor.u32 %v795_v11, %v793_v10  ;;  %v785_v26 = vrot.slane %v783_v12, 1  ;;  %v811_v35 = vsel %vm604_vm7, %v808_v9, %v810_v34 }
 0x2d4   : > { %812 = vrot.lane.b32.xlu1 %v809_v23, %s2288_s15  ;;  %v781_v28 = vor.u32 %v780_v21, %v776_v14 }
 0x2d5   : > { %802 = vrot.lane.b32.xlu0 %v797_v24, %s2289_s26  ;;  %v789_v30 = vor.u32 %v787_v27, %v785_v26 }
 0x2d6   : > { %v786_v33 = vsel %vm571_vm8, %v781_v28, %v785_v26 }
 0x2d7   : > { %v794_v31 = vsel %vm571_vm8, %v789_v30, %v793_v10 }
 0x2d8   : > { %800 = vrot.lane.b32.xlu1 %v794_v31, %s2289_s26 }
 0x2d9   : > { %798 = vrot.lane.b32.xlu0 %v786_v33, %s2289_s26 }
 0x2dc   : > { %816 = vrot.lane.b32.xlu1 %v810_v34, %s2288_s15 }
 0x2dd   : > { %814 = vrot.lane.b32.xlu0 %v811_v35, %s2288_s15 }
 0x346   : > { %v813_v36 = vpop.permute.xlu1 %812 }
 0x347   : > { %v803_v37 = vpop.permute.xlu0 %802 }
 0x348   : > { %v824_v43 = vsel %vm488_vm2, %v772_v3, %v803_v37 }
 0x34a   : > { %v801_v38 = vpop.permute.xlu1 %800 }
 0x34b   : > { %v799_v40 = vpop.permute.xlu0 %798  ;;  %v822_v49 = vsel %vm488_vm2, %v771_v6, %v801_v38 }
 0x34c   : > { %v820_v41 = vsel %vm488_vm2, %v770_v39, %v799_v40  ;;  %v1902_v40 = vld [vmem:[#allocation10 + $0x18] sm:$0xff]  }
 0x34d   : > { %v826_v42 = vsel %vm623_vm10, %v820_v41, %v813_v36  ;;  %1688 = vmatprep.subr.bf16.mxu0 %v1902_v40 }
 0x34e   : > { %v844_v44 = vshrl.u32 %v826_v42, 16  ;;  %v847_v45 = vshll.u32 %v826_v42, 16  ;;  %v817_v46 = vpop.permute.xlu1 %816  ;;  %1689 = vmatpush3.bf16.msra.mxu0 %v1902_v40 }
 0x34f   : > { %v830_v47 = vsel %vm623_vm10, %v824_v43, %v817_v46  ;;  %v815_v48 = vpop.permute.xlu0 %814 }
 0x350   : > { %v859_v50 = vshrl.u32 %v830_v47, 16  ;;  %v862_v51 = vshll.u32 %v830_v47, 16  ;;  %v846_v52 = vrot.slane %v844_v44, 3  ;;  %v849_v53 = vrot.slane %v847_v45, 4 }
 0x351   : > { %v828_v54 = vsel %vm623_vm10, %v822_v49, %v815_v48 }
 0x352   : > { %v861_v55 = vrot.slane %v859_v50, 3  ;;  %v864_v56 = vrot.slane %v862_v51, 4  ;;  %v851_v57 = vshrl.u32 %v828_v54, 16  ;;  %v854_v58 = vshll.u32 %v828_v54, 16 }
 0x353   : > { %v850_v62 = vor.u32 %v849_v53, %v846_v52 }
 0x354   : > { %v865_v59 = vor.u32 %v864_v56, %v861_v55  ;;  %v853_v60 = vrot.slane %v851_v57, 3  ;;  %v856_v61 = vrot.slane %v854_v58, 4  ;;  %v1903_v57 = vld [vmem:[#allocation10 + $0x20] sm:$0xff]  }
 0x355   : > { %1690 = vmatprep.subr.bf16.mxu0 %v1903_v57 }
 0x356   : > { %v857_v63 = vor.u32 %v856_v61, %v853_v60  ;;  %1691 = vmatpush3.bf16.msra.mxu0 %v1903_v57 }
 0x358   : > { %v858_v0 = vsel %vm3189_vm11, %v850_v62, %v857_v63  ;;  %v866_v1 = vsel %vm3190_vm14, %v857_v63, %v865_v59  ;;  %v1904_v63 = vld [vmem:[#allocation10 + $0x28] sm:$0xff]  }
 0x359   : > { %1684 = vmatprep.mubr.msk.bf16.mxu1 %vm685_vm13, %v858_v0  ;;  %1692 = vmatprep.subr.bf16.mxu0 %v1904_v63 }
 0x35a   : > { %1685 = vmatmul.mubr.msk.bf16.vlgmr.msra.gmra.mrb[0].mxu1 %vm685_vm13, %v866_v1  ;;  %1693 = vmatpush3.bf16.msra.mxu0 %v1904_v63 }
 0x35b   : > { %1699 = vmatpush3.bf16.msra.mxu1 %v1905_v22 }
 0x42d   : > { %v1686_v3 = vpop.f32.mrb[0].mxu1 }
 0x42e   : > { %v934_v4 = vadd.f32 %v1686_v3, %v1618_v2  ;;  %v925_v5 = vpop.f32.mrb[1].mxu1 }
 0x42f   : > { %v926_v6 = vadd.f32 %v1618_v2, %v925_v5  ;;  %v1687_v7 = vpop.f32.mrb[2].mxu1 }
 0x430   : > { %v946_v8 = vadd.f32 %v934_v4, %v2800_v18  ;;  %v937_v9 = vadd.f32 %v1687_v7, %v1618_v2  ;;  %v928_v10 = vpop.f32.mrb[3].mxu1 }
 0x431   : > { %v944_v11 = vadd.f32 %v926_v6, %v2796_v16  ;;  %v929_v12 = vadd.f32 %v1618_v2, %v928_v10 }
 0x432   : > { %950 = vst.msk [vmem:[#allocation2 + $0x10] sm:$0xff] %vm488_vm2, %v946_v8  ;;  %v947_v13 = vadd.f32 %v937_v9, %v2806_v20 }
 0x433   : > { %948 = vst.msk [vmem:[#allocation2] sm:$0xff] %vm488_vm2, %v944_v11  ;;  %v945_v14 = vadd.f32 %v929_v12, %v2798_v17 }
 0x434   : > { %951 = vst.msk [vmem:[#allocation2 + $0x18] sm:$0xff] %vm488_vm2, %v947_v13 }
 0x435   : > { %949 = vst.msk [vmem:[#allocation2 + $0x8] sm:$0xff] %vm488_vm2, %v945_v14 }
 0x439   : > { %v2902_v21 = vld [vmem:[#allocation2 + $0x10] sm:$0xff] }
 0x43a   : > { %vm958_vm15 = vcmp.ge.f32.partialorder %v2902_v21, 0.0  ;;  %v962_v18 = vmul.f32 0.1, %v2902_v21  ;;  %v2906_v16 = vld [vmem:[#allocation2] sm:$0xff] }
 0x43b   : > { %vm956_vm4 = vcmp.ge.f32.partialorder %v2906_v16, 0.0  ;;  %v960_v20 = vmul.f32 0.1, %v2906_v16  ;;  %v2910_v23 = vld [vmem:[#allocation2 + $0x18] sm:$0xff] }
 0x43c   : > { %v966_v17 = vsel %vm958_vm15, %v2902_v21, %v962_v18  ;;  %vm959_vm11 = vcmp.ge.f32.partialorder %v2910_v23, 0.0  ;;  %v963_v24 = vmul.f32 0.1, %v2910_v23  ;;  %v2915_v26 = vld [vmem:[#allocation2 + $0x8] sm:$0xff]  ;;  %vm1028_vm15 = vcmask 1044480  }
 0x43d   : > { %v964_v27 = vsel %vm956_vm4, %v2906_v16, %v960_v20  ;;  %vm957_vm14 = vcmp.ge.f32.partialorder %v2915_v26, 0.0  ;;  %v961_v28 = vmul.f32 0.1, %v2915_v26  ;;  %v970_v30 = vsel %vm2813_vm3, %v966_v17, 0.0 }
 0x43e   : > { %v967_v29 = vsel %vm959_vm11, %v2910_v23, %v963_v24  ;;  %v968_v33 = vsel %vm2792_vm9, %v964_v27, 0.0  ;;  %vm992_vm4 = vsmask.f32 6400  ;;  %vm1069_vm11 = vsmask.f32 5376 }
 0x43f   : > { %v971_v31 = vsel %vm2821_vm5, %v967_v29, 0.0  ;;  %v965_v32 = vsel %vm957_vm14, %v2915_v26, %v961_v28 }
 0x440   : > { %v973_v34 = vpack.c.bf16 %v971_v31, %v970_v30  ;;  %v969_v35 = vsel %vm2802_vm12, %v965_v32, 0.0 }
 0x441   : > { %v972_v36 = vpack.c.bf16 %v969_v35, %v968_v33 }
 0x442   : > { %v977_v37 = vrot.slane %v973_v34, 4 }
 0x443   : > { %v976_v38 = vrot.slane %v972_v36, 4 }
 0x444   : > { %984 = vst.msk [vmem:[#allocation3 + $0x10] sm:$0xf] %vm496_vm1, %v977_v37 }
 0x445   : > { %982 = vst.msk [vmem:[#allocation3] sm:$0xf0] %vm498_vm0, %v976_v38  ;;  %v978_v39 = vsel %vm556_vm6, %v976_v38, %v977_v37 }
 0x446   : > { %983 = vst.msk [vmem:[#allocation3 + $0x8] sm:$0xff] %vm488_vm2, %v978_v39 }
 0x44b   : > { %v989_v41 = vld [vmem:[#allocation3 + $0x10] sm:$0xf] }
 0x44c   : > { %v990_v42 = vld [vmem:[#allocation3] sm:$0xe0]  ;;  %v1011_v43 = vshrl.u32 %v989_v41, 16  ;;  %v1014_v44 = vshll.u32 %v989_v41, 16  ;;  %v991_v1 = vld [vmem:[#allocation3 + $0x10] sm:$0x3f] }
 0x44d   : > { %v988_v45 = vld [vmem:[#allocation3] sm:$0xf0]  ;;  %v986_v46 = vld [vmem:[#allocation3 + $0x8] sm:$0xff]  ;;  %v1029_v47 = vrot.slane %v990_v42, 3  ;;  %v1032_v4 = vrot.slane %v991_v1, 3 }
 0x44e   : > { %v994_v48 = vshrl.u32 %v988_v45, 16  ;;  %v997_v49 = vshll.u32 %v988_v45, 16  ;;  %v1030_v50 = vrot.slane %v986_v46, 3  ;;  %v1013_v51 = vrot.slane %v1011_v43, 1  ;;  %v985_v9 = vld [vmem:[#allocation3] sm:$0xfc] }
 0x44f   : > { %v1016_v52 = vrot.slane %v1014_v44, 2  ;;  %v1002_v53 = vshrl.u32 %v986_v46, 16  ;;  %v1005_v54 = vshll.u32 %v986_v46, 16  ;;  %v987_v13 = vld [vmem:[#allocation3 + $0x10] sm:$0x7] }
 0x450   : > { %v996_v55 = vrot.slane %v994_v48, 1  ;;  %v999_v56 = vrot.slane %v997_v49, 2  ;;  %v1031_v58 = vsel %vm1028_vm15, %v1029_v47, %v1030_v50  ;;  %v1033_v5 = vsel %vm1028_vm15, %v1030_v50, %v1032_v4  ;;  %v1624_v45 = vld [vmem:[#allocation12 + $0x1] ss:$0 sm:$0xff] }
 0x451   : > { %v1017_v59 = vor.u32 %v1016_v52, %v1013_v51  ;;  %v1004_v60 = vrot.slane %v1002_v53, 1  ;;  %1034 = vrot.lane.b32.xlu1 %v1031_v58, %s2288_s15  ;;  %v1007_v61 = vrot.slane %v1005_v54, 2 }
 0x452   : > { %v1000_v62 = vor.u32 %v999_v56, %v996_v55 }
 0x453   : > { %1023 = vrot.lane.b32.xlu0 %v1017_v59, %s2289_s26  ;;  %v1008_v0 = vor.u32 %v1007_v61, %v1004_v60 }
 0x455   : > { %v1018_v2 = vsel %vm992_vm4, %v1008_v0, %v1017_v59  ;;  %v1009_v3 = vsel %vm992_vm4, %v1000_v62, %v1008_v0 }
 0x456   : > { %1021 = vrot.lane.b32.xlu1 %v1018_v2, %s2289_s26 }
 0x457   : > { %1019 = vrot.lane.b32.xlu0 %v1009_v3, %s2289_s26 }
 0x45a   : > { %1038 = vrot.lane.b32.xlu1 %v1032_v4, %s2288_s15 }
 0x45b   : > { %1036 = vrot.lane.b32.xlu0 %v1033_v5, %s2288_s15 }
 0x4c3   : > { %v1035_v6 = vpop.permute.xlu1 %1034 }
 0x4c5   : > { %v1024_v7 = vpop.permute.xlu0 %1023 }
 0x4c6   : > { %v1047_v20 = vsel %vm488_vm2, %v987_v13, %v1024_v7 }
 0x4c8   : > { %v1022_v8 = vpop.permute.xlu1 %1021 }
 0x4c9   : > { %v1020_v10 = vpop.permute.xlu0 %1019  ;;  %v1044_v17 = vsel %vm488_vm2, %v986_v46, %v1022_v8 }
 0x4ca   : > { %v1042_v11 = vsel %vm488_vm2, %v985_v9, %v1020_v10 }
 0x4cb   : > { %v1049_v12 = vsel %vm623_vm10, %v1042_v11, %v1035_v6 }
 0x4cc   : > { %v1070_v14 = vshrl.u32 %v1049_v12, 16  ;;  %v1073_v18 = vshll.u32 %v1049_v12, 16  ;;  %v1039_v24 = vpop.permute.xlu1 %1038 }
 0x4cd   : > { %v1037_v27 = vpop.permute.xlu0 %1036  ;;  %v1053_v30 = vsel %vm623_vm10, %v1047_v20, %v1039_v24 }
 0x4ce   : > { %v1072_v28 = vrot.slane %v1070_v14, 2  ;;  %v1075_v29 = vrot.slane %v1073_v18, 3  ;;  %v1051_v31 = vsel %vm623_vm10, %v1044_v17, %v1037_v27  ;;  %v1085_v32 = vshrl.u32 %v1053_v30, 16  ;;  %v1906_v14 = vld [vmem:[#allocation13 + $0x20] sm:$0xff]  }
 0x4cf   : > { %v1088_v33 = vshll.u32 %v1053_v30, 16  ;;  %v1077_v34 = vshrl.u32 %v1051_v31, 16  ;;  %v1080_v35 = vshll.u32 %v1051_v31, 16  ;;  %1700 = vmatprep.subr.bf16.mxu1 %v1906_v14  ;;  %v1907_v31 = vld [vmem:[#allocation13 + $0x28] sm:$0xff]  }
 0x4d0   : > { %v1087_v36 = vrot.slane %v1085_v32, 2  ;;  %v1076_v40 = vor.u32 %v1075_v29, %v1072_v28  ;;  %1701 = vmatpush3.bf16.msra.mxu1 %v1906_v14 }
 0x4d1   : > { %v1090_v37 = vrot.slane %v1088_v33, 3  ;;  %v1079_v38 = vrot.slane %v1077_v34, 2  ;;  %v1082_v39 = vrot.slane %v1080_v35, 3  ;;  %1702 = vmatprep.subr.bf16.mxu1 %v1907_v31 }
 0x4d3   : > { %v1091_v41 = vor.u32 %v1090_v37, %v1087_v36  ;;  %v1083_v42 = vor.u32 %v1082_v39, %v1079_v38 }
 0x4d4   : > { %1703 = vmatpush3.bf16.msra.mxu1 %v1907_v31 }
 0x4d5   : > { %v1084_v43 = vsel %vm1069_vm11, %v1076_v40, %v1083_v42  ;;  %v1092_v44 = vsel %vm1069_vm11, %v1083_v42, %v1091_v41 }
 0x4d6   : > { %1694 = vmatprep.mubr.msk.bf16.mxu0 %vm685_vm13, %v1084_v43 }
 0x4d7   : > { %1695 = vmatmul.mubr.msk.bf16.vlgmr.msra.gmra.mrb[4].mxu0 %vm685_vm13, %v1092_v44 }
 0x5aa   : > { %v1696_v46 = vpop.f32.mrb[4].mxu0 }
 0x5ab   : > { %v1160_v47 = vadd.f32 %v1696_v46, %v1624_v45  ;;  %v1151_v48 = vpop.f32.mrb[5].mxu0 }
 0x5ac   : > { %v1152_v49 = vadd.f32 %v1624_v45, %v1151_v48  ;;  %v1697_v50 = vpop.f32.mrb[6].mxu0 }
 0x5ad   : > { %vm1168_vm14 = vcmp.ge.f32.partialorder %v1160_v47, 0.0  ;;  %v1172_v51 = vmul.f32 0.1, %v1160_v47  ;;  %v1163_v52 = vadd.f32 %v1697_v50, %v1624_v45  ;;  %v1154_v53 = vpop.f32.mrb[7].mxu0 }
 0x5ae   : > { %vm1166_vm15 = vcmp.ge.f32.partialorder %v1152_v49, 0.0  ;;  %v1170_v54 = vmul.f32 0.1, %v1152_v49  ;;  %v1155_v55 = vadd.f32 %v1624_v45, %v1154_v53 }
 0x5af   : > { %v1176_v56 = vsel %vm1168_vm14, %v1160_v47, %v1172_v51  ;;  %vm1169_vm4 = vcmp.ge.f32.partialorder %v1163_v52, 0.0  ;;  %v1173_v57 = vmul.f32 0.1, %v1163_v52 }
 0x5b0   : > { %v1174_v58 = vsel %vm1166_vm15, %v1152_v49, %v1170_v54  ;;  %vm1167_vm11 = vcmp.ge.f32.partialorder %v1155_v55, 0.0  ;;  %v1171_v59 = vmul.f32 0.1, %v1155_v55  ;;  %v1180_v61 = vsel %vm2813_vm3, %v1176_v56, 0.0 }
 0x5b1   : > { %v1177_v60 = vsel %vm1169_vm4, %v1163_v52, %v1173_v57  ;;  %v1178_v0 = vsel %vm2792_vm9, %v1174_v58, 0.0 }
 0x5b2   : > { %v1181_v62 = vsel %vm2821_vm5, %v1177_v60, 0.0  ;;  %v1175_v63 = vsel %vm1167_vm11, %v1155_v55, %v1171_v59 }
 0x5b3   : > { %v1183_v1 = vpack.c.bf16 %v1181_v62, %v1180_v61  ;;  %v1179_v2 = vsel %vm2802_vm12, %v1175_v63, 0.0 }
 0x5b4   : > { %v1182_v3 = vpack.c.bf16 %v1179_v2, %v1178_v0 }
 0x5b5   : > { %v1187_v4 = vrot.slane %v1183_v1, 4 }
 0x5b6   : > { %v1186_v5 = vrot.slane %v1182_v3, 4  ;;  %v1630_v3 = vld [vmem:[#allocation15 + $0x1] ss:$0 sm:$0xff] }
 0x5b7   : > { %1194 = vst.msk [vmem:[#allocation3 + $0x10] sm:$0xf] %vm496_vm1, %v1187_v4 }
 0x5b8   : > { %v1188_v6 = vsel %vm556_vm6, %v1186_v5, %v1187_v4  ;;  %1192 = vst.msk [vmem:[#allocation3] sm:$0xf0] %vm498_vm0, %v1186_v5  ;;  %vm3191_vm0 = vsmask.f32 4352 }
 0x5b9   : > { %1193 = vst.msk [vmem:[#allocation3 + $0x8] sm:$0xff] %vm488_vm2, %v1188_v6  ;;  %vm3192_vm1 = vmmov %vm3191_vm0 }
 0x5be   : > { %v1197_v25 = vld [vmem:[#allocation3 + $0x10] sm:$0xf] }
 0x5bf   : > { %v1198_v7 = vld [vmem:[#allocation3] sm:$0xf0]  ;;  %v1216_v15 = vshll.u32 %v1197_v25, 16  ;;  %v1220_v12 = vshrl.u32 %v1197_v25, 16  ;;  %v1199_v33 = vld [vmem:[#allocation3 + $0x10] sm:$0x1f] }
 0x5c0   : > { %v1196_v8 = vld [vmem:[#allocation3 + $0x8] sm:$0xff]  ;;  %v1232_v9 = vrot.slane %v1198_v7, 1  ;;  %v1203_v19 = vshll.u32 %v1198_v7, 16  ;;  %v1201_v18 = vshrl.u32 %v1198_v7, 16  ;;  %v1235_v35 = vrot.slane %v1199_v33, 1 }
 0x5c1   : > { %v1233_v10 = vrot.slane %v1196_v8, 1  ;;  %v1218_v11 = vrot.slane %v1216_v15, 1  ;;  %v1208_v13 = vshll.u32 %v1196_v8, 16  ;;  %v1212_v28 = vshrl.u32 %v1196_v8, 16  ;;  %v1195_v40 = vld [vmem:[#allocation3] sm:$0xf8] }
 0x5c2   : > { %v1205_v20 = vrot.slane %v1203_v19, 1 }
 0x5c3   : > { %v1234_v17 = vsel %vm604_vm7, %v1232_v9, %v1233_v10  ;;  %v1222_v24 = vor.u32 %v1220_v12, %v1218_v11  ;;  %v1210_v27 = vrot.slane %v1208_v13, 1  ;;  %v1236_v36 = vsel %vm604_vm7, %v1233_v10, %v1235_v35 }
 0x5c4   : > { %1237 = vrot.lane.b32.xlu1 %v1234_v17, %s2288_s15  ;;  %v1206_v29 = vor.u32 %v1205_v20, %v1201_v18 }
 0x5c5   : > { %1227 = vrot.lane.b32.xlu0 %v1222_v24, %s2289_s26  ;;  %v1214_v30 = vor.u32 %v1212_v28, %v1210_v27 }
 0x5c6   : > { %v1211_v34 = vsel %vm571_vm8, %v1206_v29, %v1210_v27 }
 0x5c7   : > { %v1219_v32 = vsel %vm571_vm8, %v1214_v30, %v1218_v11 }
 0x5c8   : > { %1225 = vrot.lane.b32.xlu1 %v1219_v32, %s2289_s26 }
 0x5c9   : > { %1223 = vrot.lane.b32.xlu0 %v1211_v34, %s2289_s26 }
 0x5cc   : > { %1241 = vrot.lane.b32.xlu1 %v1235_v35, %s2288_s15 }
 0x5cd   : > { %1239 = vrot.lane.b32.xlu0 %v1236_v36, %s2288_s15 }
 0x636   : > { %v1238_v37 = vpop.permute.xlu1 %1237 }
 0x637   : > { %v1228_v38 = vpop.permute.xlu0 %1227 }
 0x638   : > { %v1249_v44 = vsel %vm488_vm2, %v1197_v25, %v1228_v38 }
 0x63a   : > { %v1226_v39 = vpop.permute.xlu1 %1225 }
 0x63b   : > { %v1224_v41 = vpop.permute.xlu0 %1223  ;;  %v1247_v50 = vsel %vm488_vm2, %v1196_v8, %v1226_v39 }
 0x63c   : > { %v1245_v42 = vsel %vm488_vm2, %v1195_v40, %v1224_v41 }
 0x63d   : > { %v1251_v43 = vsel %vm623_vm10, %v1245_v42, %v1238_v37 }
 0x63e   : > { %v1242_v45 = vpop.permute.xlu1 %1241  ;;  %v1271_v46 = vshrl.u32 %v1251_v43, 16  ;;  %v1274_v47 = vshll.u32 %v1251_v43, 16 }
 0x63f   : > { %v1255_v48 = vsel %vm623_vm10, %v1249_v44, %v1242_v45  ;;  %v1240_v49 = vpop.permute.xlu0 %1239 }
 0x640   : > { %v1286_v51 = vshrl.u32 %v1255_v48, 16  ;;  %v1289_v52 = vshll.u32 %v1255_v48, 16  ;;  %v1253_v53 = vsel %vm623_vm10, %v1247_v50, %v1240_v49  ;;  %v1273_v57 = vrot.slane %v1271_v46, 3 }
 0x641   : > { %v1278_v56 = vshrl.u32 %v1253_v53, 16  ;;  %v1276_v58 = vrot.slane %v1274_v47, 4  ;;  %v1281_v59 = vshll.u32 %v1253_v53, 16 }
 0x642   : > { %v1288_v54 = vrot.slane %v1286_v51, 3  ;;  %v1291_v55 = vrot.slane %v1289_v52, 4 }
 0x643   : > { %v1280_v60 = vrot.slane %v1278_v56, 3  ;;  %v1283_v62 = vrot.slane %v1281_v59, 4  ;;  %v1277_v63 = vor.u32 %v1276_v58, %v1273_v57 }
 0x644   : > { %v1292_v61 = vor.u32 %v1291_v55, %v1288_v54 }
 0x645   : > { %v1284_v0 = vor.u32 %v1283_v62, %v1280_v60 }
 0x647   : > { %v1285_v1 = vsel %vm3191_vm0, %v1277_v63, %v1284_v0  ;;  %v1293_v2 = vsel %vm3192_vm1, %v1284_v0, %v1292_v61 }
 0x648   : > { %1704 = vmatprep.mubr.msk.bf16.mxu1 %vm685_vm13, %v1285_v1 }
 0x649   : > { %1705 = vmatmul.mubr.msk.bf16.vlgmr.msra.gmra.mrb[4].mxu1 %vm685_vm13, %v1293_v2 }
 0x71c   : > { %v1706_v4 = vpop.f32.mrb[4].mxu1 }
 0x71d   : > { %v1361_v5 = vadd.f32 %v1706_v4, %v1630_v3  ;;  %v1352_v6 = vpop.f32.mrb[5].mxu1 }
 0x71e   : > { %v1353_v22 = vadd.f32 %v1630_v3, %v1352_v6  ;;  %v1707_v25 = vpop.f32.mrb[6].mxu1 }
 0x71f   : > { %v1373_v7 = vadd.f32 %v1361_v5, %v2902_v21  ;;  %v1364_v15 = vadd.f32 %v1707_v25, %v1630_v3  ;;  %v1355_v8 = vpop.f32.mrb[7].mxu1 }
 0x720   : > { %v1371_v9 = vadd.f32 %v1353_v22, %v2906_v16  ;;  %v1356_v19 = vadd.f32 %v1630_v3, %v1355_v8 }
 0x721   : > { %1377 = vst.msk [vmem:[#allocation2 + $0x10] sm:$0xff] %vm488_vm2, %v1373_v7  ;;  %v1374_v10 = vadd.f32 %v1364_v15, %v2910_v23 }
 0x722   : > { %1375 = vst.msk [vmem:[#allocation2] sm:$0xff] %vm488_vm2, %v1371_v9  ;;  %v1372_v11 = vadd.f32 %v1356_v19, %v2915_v26 }
 0x723   : > { %1378 = vst.msk [vmem:[#allocation2 + $0x18] sm:$0xff] %vm488_vm2, %v1374_v10 }
 0x724   : > { %1376 = vst.msk [vmem:[#allocation2 + $0x8] sm:$0xff] %vm488_vm2, %v1372_v11 }
 0x728   : > { %v1380_v21 = vld [vmem:[#allocation2 + $0x10] sm:$0xff] }
 0x729   : > { %1382 = vst.msk [vmem:[%s475_s11 + $0x8] sm:$0xff] %vm488_vm2, %v1380_v21 }
 0x72b   : > { %v1379_v16 = vld [vmem:[#allocation2 + $0x8] sm:$0xff] }
 0x72c   : > { %1381 = vst.msk [vmem:[%s475_s11] sm:$0xff] %vm488_vm2, %v1379_v16 }
 0x72d   : > { %2123 = shalt.err (!%p2120_p12)
}
 0x72e   : > { %s2124_s16 = scalar_lea.hbm %s2997_s21, 256  ;;  %s2128_s15 = scalar_lea.hbm %s3195_s18, 2048 }
 0x72f   : > { %p2125_p11 = scmp.ne.s32.totalorder %s2997_s21, %s2124_s16  ;;  %p2129_p4 = scmp.lt.u32.totalorder %s2997_s21, %s3195_s18 }
 0x730   : > { %p2130_p8 = scmp.lt.u32.totalorder %s2128_s15, %s2124_s16  ;;  %p2132_p5 = scmp.lt.u32.totalorder %s2124_s16, %s2997_s21 }
 0x731   : > { %p2126_p9 = pnand %p2125_p11, %p3196_p6 }
 0x732   : > { %p2131_p7 = por %p2130_p8, %p2129_p4 }
 0x733   : > { %p2127_p0 = pneg %p2126_p9 }
 0x734   : > { %p2133_p2 = por %p2132_p5, %p2131_p7 }
 0x736   : > { %p2134_p10 = pnand %p2133_p2, %p2127_p0 }
 0x738   : > { %2137 = shalt.err (!%p2134_p10)
}
 0x739   : > { %s2291_s7 = smov 128   ;;  %s2292_s20 = smov 8  }
 0x73a   : > { %1730 = dma.vmem_to_hbm [thread:$0]  (%p3196_p6), %s2999_s3, 256, %s2997_s21, %s3004_s22, %s2291_s7, %s2291_s7, %s2292_s20  }
 0x73b PF: > { %s3197_s4 = sld [smem:[#allocation26_spill]]  ;;  %s3198_s10 = sld [smem:[#allocation34_spill]] }
 0x73c   : > { %p1768_p13 = scmp.ge.s32.totalorder %s2272_s14, 2 }
 0x741   : > { %s1414_s11 = sand.u32 1, %s3197_s4   ;;  %p3199_p3 = scmp.ne.s32.totalorder %s3198_s10, 0 }
 0x742   : > { %s1415_s24 = scalar_lea.sflag [#allocation6], %s1414_s11 }
 0x743   : > { %p1756_p1 = pnand %p1768_p13, %p3199_p3 }
 0x745   : > { %2215 = dma.done.wait (!%p1756_p1), %s1415_s24, 256  }
 0x746   : > { %2217 = vsyncadd (!%p1756_p1), %s1415_s24, 4294967040  ;;  %s28_s14 = sadd.s32 1, %s2272_s14   ;;  %s3201_s24 = sld [smem:[#allocation24_spill]] }
 0x747   : > { %p3033_p12 = scmp.ge.s32.totalorder %s28_s14, 10   ;;  %s3202_s6 = sld [smem:[#allocation25_spill]] }
 0x748   : > { %s3203_s3 = smov %s2633_s30  ;;  %s3204_s10 = sld [smem:[#allocation29_spill]] }
 0x749   : > { %s3205_s11 = sld [smem:[#allocation30_spill]]  ;;  %s3206_s12 = sld [smem:[#allocation35_spill]] }
 0x74a   : > { %s3207_s13 = sld [smem:[#allocation36_spill]]  ;;  %s3210_s26 = smov %s3232_s1 }
 0x74b   : > { %s3211_s27 = smov %s2236_s28  ;;  %s3212_s28 = smov %s2240_s29 }
 0x74c   : > { %s3213_s29 = smov %s2630_s5  ;;  %s3214_s30 = smov %s2248_s8 }
 0x74d   : > { %s3209_s25 = smov %s3202_s6  ;;  %s3215_s8 = smov %s2252_s9 }
 0x74e   : > { %s3216_s9 = smov %s3203_s3  ;;  %27 = sbr.rel (!%p3033_p12) target bundleno = 23 (0x17), region = 137 }
 0x755   :  { %1420 = vsyncpa [#allocation5], 1 }
 0x756   :  { %1422 = vsyncpa [#allocation5 + $0x1], 1 }
 0x757   :  { %1423 = vsyncpa [#allocation8], 1 }
 0x758   :  { %1425 = vsyncpa [#allocation8 + $0x1], 1 }
 0x759   :  { %1426 = vsyncpa [#allocation11], 1 }
 0x75a   :  { %1427 = vsyncpa [#allocation14], 1 }
 0x75b   :  { %1428 = vsyncpa [#allocation6], 1 }
 0x75c   :  { %1430 = vsyncpa [#allocation6 + $0x1], 1 }

</bundles_post_ra>
